<compile_context>
chip_gen: v7x
topology: tpu7x:2x2x1
jax: 0.10.0
libtpu: 0.0.40
codegen_flags: <defaults>
</compile_context>

<pallas_src>
import functools
import math

import jax
import jax.numpy as jnp
from jax.experimental import pallas as pl
from jax.experimental.pallas import tpu as pltpu


NUM_BENDS = 3
_LANE = 128     # lane width (last dim)
_SUBLANE = 8    # sublane height (second-to-last dim)


def _round_up(x, m):
    return ((x + m - 1) // m) * m


def bezier_coeffs(t, num_bends=NUM_BENDS):
    """Bezier coeff_layer: C(n-1,k) * t^k * (1-t)^(n-1-k)."""
    t = jnp.asarray(t, jnp.float32)
    binom = jnp.array(
        [math.comb(num_bends - 1, k) for k in range(num_bends)], jnp.float32
    )
    k = jnp.arange(num_bends, dtype=jnp.float32)
    return binom * (t ** k) * ((1.0 - t) ** (num_bends - 1 - k))


def _fused_curve_mlp_kernel(coeffs_ref, x_ref, w1_ref, b1_ref, w2_ref, b2_ref,
                            o_ref, *, num_bends):
    """Fused: CurveLinear -> ReLU -> CurveLinear, bend blend on the MXU K dim.

    coeffs_ref : SMEM (num_bends,)                 f32  curve coefficients
    x_ref      : VMEM (Bp, In_pad)                 f32  padded flattened input
    w1_ref     : VMEM (num_bends*In_pad, H_pad)    f32  layer-1 bend-stacked W
    b1_ref     : VMEM (num_bends, 1, H_pad)        f32  layer-1 per-bend bias
    w2_ref     : VMEM (num_bends*H_pad, C_pad)     f32  layer-2 bend-stacked W
    b2_ref     : VMEM (num_bends, 1, C_pad)        f32  layer-2 per-bend bias
    o_ref      : VMEM (Bp, C_pad)                  f32  padded output
    """
    c = [coeffs_ref[j] for j in range(num_bends)]
    x = x_ref[...]

    # ---- layer 1: blend via coefficient-scaled concat along K ----
    # x_cat @ [W_0; W_1; W_2] == x @ (sum_j c_j W_j)
    x_cat = jnp.concatenate([c[j] * x for j in range(num_bends)], axis=1)
    b1 = b1_ref[...]                          # (nb, 1, H_pad)
    b1_t = c[0] * b1[0]
    for j in range(1, num_bends):
        b1_t = b1_t + c[j] * b1[j]            # (1, H_pad)
    h = jnp.dot(x_cat, w1_ref[...], preferred_element_type=jnp.float32) + b1_t
    h = jnp.maximum(h, 0.0)                   # padded cols stay exactly 0

    # ---- layer 2 ----
    h_cat = jnp.concatenate([c[j] * h for j in range(num_bends)], axis=1)
    b2 = b2_ref[...]
    b2_t = c[0] * b2[0]
    for j in range(1, num_bends):
        b2_t = b2_t + c[j] * b2[j]
    out = jnp.dot(h_cat, w2_ref[...], preferred_element_type=jnp.float32) + b2_t
    o_ref[...] = out.astype(o_ref.dtype)


def fused_curve_mlp(coeffs, x_pad, w1_flat, b1_pad, w2_flat, b2_pad, *, num_bends):
    """One pallas_call for the whole 2-layer curve-MLP (everything resident)."""
    Bp, _ = x_pad.shape
    c_pad = w2_flat.shape[1]
    kernel = functools.partial(_fused_curve_mlp_kernel, num_bends=num_bends)
    return pl.pallas_call(
        kernel,
        out_shape=jax.ShapeDtypeStruct((Bp, c_pad), jnp.float32),
        in_specs=[
            pl.BlockSpec(memory_space=pltpu.MemorySpace.SMEM),   # coeffs
            pl.BlockSpec(memory_space=pltpu.MemorySpace.VMEM),   # x
            pl.BlockSpec(memory_space=pltpu.MemorySpace.VMEM),   # w1 (flat)
            pl.BlockSpec(memory_space=pltpu.MemorySpace.VMEM),   # b1
            pl.BlockSpec(memory_space=pltpu.MemorySpace.VMEM),   # w2 (flat)
            pl.BlockSpec(memory_space=pltpu.MemorySpace.VMEM),   # b2
        ],
        out_specs=pl.BlockSpec(memory_space=pltpu.MemorySpace.VMEM),
    )(coeffs, x_pad, w1_flat, b1_pad, w2_flat, b2_pad)


class CurveNetPallas:
    """CurveNet with a 2-layer curve-MLP architecture, num_bends=3, Bezier."""

    def __init__(self, num_classes, in_features, hidden, num_bends=NUM_BENDS,
                 key=jax.random.PRNGKey(0)):
        self.num_bends = num_bends
        self.num_classes = num_classes
        self.in_features = in_features
        self.hidden = hidden
        self.l2 = 0.0  # only accumulated in training mode in the torch code

        k = jax.random.split(key, 4)
        # Per-bend parameters, stacked on a leading "bend" axis.
        # PyTorch Linear weight is (Out, In); stored transposed (In, Out) so
        # the kernel computes x @ W (blending commutes with transpose).
        self.w1 = 0.05 * jax.random.normal(
            k[0], (num_bends, in_features, hidden), jnp.float32)
        self.b1 = 0.05 * jax.random.normal(
            k[1], (num_bends, hidden), jnp.float32)
        self.w2 = 0.05 * jax.random.normal(
            k[2], (num_bends, hidden, num_classes), jnp.float32)
        self.b2 = 0.05 * jax.random.normal(
            k[3], (num_bends, num_classes), jnp.float32)

        # ---- padded / pre-flattened kernel operands (zeros in padding) ----
        self.in_pad = _round_up(in_features, _LANE)
        self.h_pad = _round_up(hidden, _LANE)
        self.c_pad = _round_up(num_classes, _LANE)

        w1p = jnp.zeros((num_bends, self.in_pad, self.h_pad), jnp.float32)
        w1p = w1p.at[:, :in_features, :hidden].set(self.w1)
        self.w1_flat = w1p.reshape(num_bends * self.in_pad, self.h_pad)
        self.b1_pad = jnp.zeros((num_bends, 1, self.h_pad), jnp.float32)
        self.b1_pad = self.b1_pad.at[:, 0, :hidden].set(self.b1)

        w2p = jnp.zeros((num_bends, self.h_pad, self.c_pad), jnp.float32)
        w2p = w2p.at[:, :hidden, :num_classes].set(self.w2)
        self.w2_flat = w2p.reshape(num_bends * self.h_pad, self.c_pad)
        self.b2_pad = jnp.zeros((num_bends, 1, self.c_pad), jnp.float32)
        self.b2_pad = self.b2_pad.at[:, 0, :num_classes].set(self.b2)

    def forward(self, x_nchw, t):
        # CurveNet.forward: if t is None it is sampled ~ U(0,1); we take t
        # explicitly for determinism.
        coeffs_t = bezier_coeffs(t, self.num_bends)
        B = x_nchw.shape[0]
        x = x_nchw.reshape(B, -1).astype(jnp.float32)  # flatten, torch order
        bp = max(_SUBLANE, _round_up(B, _SUBLANE))
        x_pad = jnp.zeros((bp, self.in_pad), jnp.float32)
        x_pad = x_pad.at[:B, :self.in_features].set(x)

        out_pad = fused_curve_mlp(
            coeffs_t, x_pad, self.w1_flat, self.b1_pad,
            self.w2_flat, self.b2_pad, num_bends=self.num_bends)

        # eval-mode semantics: self._compute_l2() sums module.l2 which is only
        # populated under module.training; stays 0.0 here.
        # TODO(synk): perm_train=True branch (weight_permutation_perm_train
        # permutation-matrix re-orientation of the last bend) is not exercised.
        return out_pad[:B, :self.num_classes]


def _reference_forward(model, x_nchw, t):
    """Pure-JAX reference of the same forward (for correctness check)."""
    c = bezier_coeffs(t, model.num_bends)
    x = x_nchw.reshape(x_nchw.shape[0], -1)
    w1 = jnp.einsum("j,jio->io", c, model.w1)
    b1 = jnp.einsum("j,jo->o", c, model.b1)
    w2 = jnp.einsum("j,jio->io", c, model.w2)
    b2 = jnp.einsum("j,jo->o", c, model.b2)
    h = jnp.maximum(x @ w1 + b1, 0.0)
    return h @ w2 + b2


if __name__ == "__main__":
    B, C, H, W = 2, 4, 16, 16
    hidden, num_classes = 32, 10

    key = jax.random.PRNGKey(0)
    kx, kp = jax.random.split(key)
    x = jax.random.normal(kx, (B, C, H, W), jnp.float32)  # NCHW input
    t = jnp.float32(0.3)                                  # curve position

    model = CurveNetPallas(num_classes=num_classes, in_features=C * H * W,
                           hidden=hidden, key=kp)

    out = model.forward(x, t)
    out = jax.block_until_ready(out)

    ref = _reference_forward(model, x, t)
    assert out.shape == (B, num_classes)
    assert jnp.allclose(out, ref, atol=1e-4, rtol=1e-4)

    print("KERNEL_OK")
</pallas_src>

<mosaic_0001>
module attributes {stable_mosaic.version = 11 : i64} {
  func.func @_fused_curve_mlp_kernel(%arg0: memref<3xf32, #tpu.memory_space<smem>>, %arg1: memref<8x1024xf32, #tpu.memory_space<vmem>>, %arg2: memref<3072x128xf32, #tpu.memory_space<vmem>>, %arg3: memref<3x1x128xf32, #tpu.memory_space<vmem>>, %arg4: memref<384x128xf32, #tpu.memory_space<vmem>>, %arg5: memref<3x1x128xf32, #tpu.memory_space<vmem>>, %arg6: memref<8x128xf32, #tpu.memory_space<vmem>>) attributes {dimension_semantics = [], scalar_prefetch = 0 : i64, scratch_operands = 0 : i64, tpu.core_type = #tpu.core_type<tc>} {
    %c0 = arith.constant 0 : index
    %0 = memref.load %arg0[%c0] : memref<3xf32, #tpu.memory_space<smem>>
    %c1 = arith.constant 1 : index
    %1 = memref.load %arg0[%c1] : memref<3xf32, #tpu.memory_space<smem>>
    %c2 = arith.constant 2 : index
    %2 = memref.load %arg0[%c2] : memref<3xf32, #tpu.memory_space<smem>>
    %c0_0 = arith.constant 0 : index
    %c0_1 = arith.constant 0 : index
    %3 = vector.load %arg1[%c0_0, %c0_1] : memref<8x1024xf32, #tpu.memory_space<vmem>>, vector<8x1024xf32>
    %4 = vector.broadcast %0 : f32 to vector<8x1024xf32>
    %5 = arith.mulf %4, %3 : vector<8x1024xf32>
    %6 = vector.broadcast %1 : f32 to vector<8x1024xf32>
    %7 = arith.mulf %6, %3 : vector<8x1024xf32>
    %8 = vector.broadcast %2 : f32 to vector<8x1024xf32>
    %9 = arith.mulf %8, %3 : vector<8x1024xf32>
    %10 = tpu.concatenate %5, %7, %9 in 1 : vector<8x1024xf32>, vector<8x1024xf32>, vector<8x1024xf32> -> vector<8x3072xf32>
    %c0_2 = arith.constant 0 : index
    %c0_3 = arith.constant 0 : index
    %c0_4 = arith.constant 0 : index
    %11 = vector.load %arg3[%c0_2, %c0_3, %c0_4] : memref<3x1x128xf32, #tpu.memory_space<vmem>>, vector<3x1x128xf32>
    %12 = vector.extract_strided_slice %11 {offsets = [0, 0, 0], sizes = [1, 1, 128], strides = [1, 1, 1]} : vector<3x1x128xf32> to vector<1x1x128xf32>
    %13 = vector.shape_cast %12 : vector<1x1x128xf32> to vector<1x128xf32>
    %14 = vector.broadcast %0 : f32 to vector<1x128xf32>
    %15 = arith.mulf %14, %13 : vector<1x128xf32>
    %16 = vector.extract_strided_slice %11 {offsets = [1, 0, 0], sizes = [1, 1, 128], strides = [1, 1, 1]} : vector<3x1x128xf32> to vector<1x1x128xf32>
    %17 = vector.shape_cast %16 : vector<1x1x128xf32> to vector<1x128xf32>
    %18 = vector.broadcast %1 : f32 to vector<1x128xf32>
    %19 = arith.mulf %18, %17 : vector<1x128xf32>
    %20 = arith.addf %15, %19 : vector<1x128xf32>
    %21 = vector.extract_strided_slice %11 {offsets = [2, 0, 0], sizes = [1, 1, 128], strides = [1, 1, 1]} : vector<3x1x128xf32> to vector<1x1x128xf32>
    %22 = vector.shape_cast %21 : vector<1x1x128xf32> to vector<1x128xf32>
    %23 = vector.broadcast %2 : f32 to vector<1x128xf32>
    %24 = arith.mulf %23, %22 : vector<1x128xf32>
    %25 = arith.addf %20, %24 : vector<1x128xf32>
    %c0_5 = arith.constant 0 : index
    %c0_6 = arith.constant 0 : index
    %26 = vector.load %arg2[%c0_5, %c0_6] : memref<3072x128xf32, #tpu.memory_space<vmem>>, vector<3072x128xf32>
    %cst = arith.constant dense<0.000000e+00> : vector<8x128xf32>
    %27 = tpu.matmul %10, %26, %cst {dimension_numbers = #tpu.dot_dimension_numbers<[1], [0], [0], [1], [0, 0, 1, 1], [], []>} : vector<8x3072xf32>, vector<3072x128xf32>, vector<8x128xf32> -> vector<8x128xf32>
    %28 = vector.broadcast %25 : vector<1x128xf32> to vector<8x128xf32>
    %29 = arith.addf %27, %28 : vector<8x128xf32>
    %cst_7 = arith.constant 0.000000e+00 : f32
    %30 = vector.broadcast %cst_7 : f32 to vector<8x128xf32>
    %31 = arith.maximumf %29, %30 : vector<8x128xf32>
    %32 = vector.broadcast %0 : f32 to vector<8x128xf32>
    %33 = arith.mulf %32, %31 : vector<8x128xf32>
    %34 = vector.broadcast %1 : f32 to vector<8x128xf32>
    %35 = arith.mulf %34, %31 : vector<8x128xf32>
    %36 = vector.broadcast %2 : f32 to vector<8x128xf32>
    %37 = arith.mulf %36, %31 : vector<8x128xf32>
    %38 = tpu.concatenate %33, %35, %37 in 1 : vector<8x128xf32>, vector<8x128xf32>, vector<8x128xf32> -> vector<8x384xf32>
    %c0_8 = arith.constant 0 : index
    %c0_9 = arith.constant 0 : index
    %c0_10 = arith.constant 0 : index
    %39 = vector.load %arg5[%c0_8, %c0_9, %c0_10] : memref<3x1x128xf32, #tpu.memory_space<vmem>>, vector<3x1x128xf32>
    %40 = vector.extract_strided_slice %39 {offsets = [0, 0, 0], sizes = [1, 1, 128], strides = [1, 1, 1]} : vector<3x1x128xf32> to vector<1x1x128xf32>
    %41 = vector.shape_cast %40 : vector<1x1x128xf32> to vector<1x128xf32>
    %42 = vector.broadcast %0 : f32 to vector<1x128xf32>
    %43 = arith.mulf %42, %41 : vector<1x128xf32>
    %44 = vector.extract_strided_slice %39 {offsets = [1, 0, 0], sizes = [1, 1, 128], strides = [1, 1, 1]} : vector<3x1x128xf32> to vector<1x1x128xf32>
    %45 = vector.shape_cast %44 : vector<1x1x128xf32> to vector<1x128xf32>
    %46 = vector.broadcast %1 : f32 to vector<1x128xf32>
    %47 = arith.mulf %46, %45 : vector<1x128xf32>
    %48 = arith.addf %43, %47 : vector<1x128xf32>
    %49 = vector.extract_strided_slice %39 {offsets = [2, 0, 0], sizes = [1, 1, 128], strides = [1, 1, 1]} : vector<3x1x128xf32> to vector<1x1x128xf32>
    %50 = vector.shape_cast %49 : vector<1x1x128xf32> to vector<1x128xf32>
    %51 = vector.broadcast %2 : f32 to vector<1x128xf32>
    %52 = arith.mulf %51, %50 : vector<1x128xf32>
    %53 = arith.addf %48, %52 : vector<1x128xf32>
    %c0_11 = arith.constant 0 : index
    %c0_12 = arith.constant 0 : index
    %54 = vector.load %arg4[%c0_11, %c0_12] : memref<384x128xf32, #tpu.memory_space<vmem>>, vector<384x128xf32>
    %cst_13 = arith.constant dense<0.000000e+00> : vector<8x128xf32>
    %55 = tpu.matmul %38, %54, %cst_13 {dimension_numbers = #tpu.dot_dimension_numbers<[1], [0], [0], [1], [0, 0, 1, 1], [], []>} : vector<8x384xf32>, vector<384x128xf32>, vector<8x128xf32> -> vector<8x128xf32>
    %56 = vector.broadcast %53 : vector<1x128xf32> to vector<8x128xf32>
    %57 = arith.addf %55, %56 : vector<8x128xf32>
    %c0_14 = arith.constant 0 : index
    %c0_15 = arith.constant 0 : index
    %58 = vector.load %arg6[%c0_14, %c0_15] : memref<8x128xf32, #tpu.memory_space<vmem>>, vector<8x128xf32>
    tpu.vector_store %arg6[%c0_14, %c0_15], %57 {strides = array<i32>} : memref<8x128xf32, #tpu.memory_space<vmem>>, vector<8x128xf32>,
    return
  }
}

</mosaic_0001>

<bundles_post_ra>
// kernel: tpu_custom_call.1
= control target key start
LH: loop header
LB: loop body
LE: loop exit
PB: predicated region body
PF: predicated region fallthrough
CT: control target
= control target key end

     0   :  { %11 = vsyncpa [#allocation5], 0  ;;  %s2956_s0 = inlined_call_operand.hbm [shape: f32[3], index: 0, kind: input, shape index: {}]   ;;  %s2957_s1 = inlined_call_operand.hbm [shape: f32[8,1024], index: 1, kind: input, shape index: {}]   ;;  %s2958_s2 = inlined_call_operand.hbm [shape: f32[3072,128], index: 2, kind: input, shape index: {}]   ;;  %s2959_s3 = inlined_call_operand.hbm [shape: f32[3,1,128], index: 3, kind: input, shape index: {}]   ;;  %s2960_s4 = inlined_call_operand.hbm [shape: f32[384,128], index: 4, kind: input, shape index: {}]   ;;  %s2961_s5 = inlined_call_operand.hbm [shape: f32[3,1,128], index: 5, kind: input, shape index: {}]   ;;  %s2962_s6 = inlined_call_operand.hbm [shape: f32[8,128], index: 6, kind: output, shape index: {}]  }
   0x1   :  { %12 = vsyncpa [#allocation3], 0 }
   0x2   :  { %13 = vsyncpa [#allocation8], 0 }
   0x3   :  { %14 = vsyncpa [#allocation11], 0 }
   0x4   :  { %15 = vsyncpa [#allocation4], 0  ;;  %s2722_s21 = smov [#allocation7]   ;;  %s2570_s25 = scalar_lea.hbm %s2958_s2, 49152 }
   0x5   :  { %s39_s22 = sshll.u32 %s2722_s21, 4  ;;  %p2571_p0 = scmp.ne.s32.totalorder %s2958_s2, %s2570_s25  ;;  %s40_s22 = int_to_ptr.vmem [resolvable:$true] %s39_s22 }
   0x6   :  { %p2574_p1 = scmp.lt.u32.totalorder %s2570_s25, %s2958_s2 }
   0x8   :  { %p2576_p2 = pnand %p2574_p1, %p2571_p0 }
   0xa   :  { %2579 = shalt.err (!%p2576_p2)
}
   0xb   :  { %s2580_s30 = scalar_lea.vmem %s40_s22, 49152  ;;  %p2585_p4 = scmp.lt.s32.totalorder %s40_s22, %s40_s22 }
   0xc   :  { %p2581_p3 = scmp.ne.s32.totalorder %s40_s22, %s2580_s30  ;;  %p2586_p5 = scmp.lt.s32.totalorder %s2580_s30, %s2580_s30 }
   0xe   :  { %p2587_p6 = por %p2586_p5, %p2585_p4 }
  0x10   :  { %p2588_p7 = pnand %p2587_p6, %p2581_p3 }
  0x12   :  { %2591 = shalt.err (!%p2588_p7)
}
  0x13   :  { %s2723_s7 = smov 128   ;;  %s2724_s8 = smov 8  }
  0x14   :  { %45 = dma.hbm_to_vmem [thread:$0]  %s2958_s2, 49152, %s40_s22, [#allocation8], %s2723_s7, %s2723_s7, %s2724_s8  }
  0x15   :  { %s2725_s11 = smov [#allocation10]   ;;  %s2592_s15 = scalar_lea.hbm %s2960_s4, 6144 }
  0x16   :  { %s63_s12 = sshll.u32 %s2725_s11, 4  ;;  %p2593_p8 = scmp.ne.s32.totalorder %s2960_s4, %s2592_s15  ;;  %s64_s12 = int_to_ptr.vmem [resolvable:$true] %s63_s12 }
  0x17   :  { %p2596_p9 = scmp.lt.u32.totalorder %s2592_s15, %s2960_s4 }
  0x19   :  { %p2598_p10 = pnand %p2596_p9, %p2593_p8 }
  0x1b   :  { %2601 = shalt.err (!%p2598_p10)
}
  0x1c   :  { %s2602_s20 = scalar_lea.vmem %s64_s12, 6144  ;;  %p2607_p12 = scmp.lt.s32.totalorder %s64_s12, %s64_s12 }
  0x1d   :  { %p2603_p11 = scmp.ne.s32.totalorder %s64_s12, %s2602_s20  ;;  %p2608_p13 = scmp.lt.s32.totalorder %s2602_s20, %s2602_s20 }
  0x1f   :  { %p2609_p0 = por %p2608_p13, %p2607_p12 }
  0x21   :  { %p2610_p1 = pnand %p2609_p0, %p2603_p11 }
  0x23   :  { %2613 = shalt.err (!%p2610_p1)
}
  0x24   :  { %69 = dma.hbm_to_vmem [thread:$0]  %s2960_s4, 6144, %s64_s12, [#allocation11], %s2723_s7, %s2723_s7, %s2724_s8  }
  0x25   :  { %s2614_s24 = scalar_lea.hbm %s2956_s0, 16 }
  0x26   :  { %p2615_p2 = scmp.ne.s32.totalorder %s2956_s0, %s2614_s24  ;;  %p2618_p3 = scmp.lt.u32.totalorder %s2614_s24, %s2956_s0 }
  0x28   :  { %p2620_p4 = pnand %p2618_p3, %p2615_p2 }
  0x2a   :  { %2623 = shalt.err (!%p2620_p4)
}
  0x2b   :  { %s2726_s29 = smov [#allocation2]   ;;  %s2727_s4 = smov [#allocation6]  }
  0x2c   :  { %23 = dma.hbm_to_smem %s2956_s0, 16, %s2726_s29, [#allocation5]  }
  0x2d   :  { %s30_s7 = sshll.u32 %s2727_s4, 4  ;;  %s2728_s8 = smov [#allocation9]   ;;  %s31_s7 = int_to_ptr.vmem [resolvable:$true] %s30_s7 }
  0x2e   :  { %s51_s10 = sshll.u32 %s2728_s8, 4  ;;  %s2624_s13 = scalar_lea.hbm %s2957_s1, 1024  ;;  %s52_s10 = int_to_ptr.vmem [resolvable:$true] %s51_s10 }
  0x2f   :  { %p2625_p5 = scmp.ne.s32.totalorder %s2957_s1, %s2624_s13  ;;  %p2628_p6 = scmp.lt.u32.totalorder %s2624_s13, %s2957_s1 }
  0x31   :  { %p2630_p7 = pnand %p2628_p6, %p2625_p5 }
  0x33   :  { %2633 = shalt.err (!%p2630_p7)
}
  0x34   :  { %s2634_s0 = scalar_lea.vmem %s31_s7, 1024  ;;  %p2639_p9 = scmp.lt.s32.totalorder %s31_s7, %s31_s7 }
  0x35   :  { %p2635_p8 = scmp.ne.s32.totalorder %s31_s7, %s2634_s0  ;;  %p2640_p10 = scmp.lt.s32.totalorder %s2634_s0, %s2634_s0 }
  0x37   :  { %p2641_p11 = por %p2640_p10, %p2639_p9 }
  0x39   :  { %p2642_p12 = pnand %p2641_p11, %p2635_p8 }
  0x3b   :  { %2645 = shalt.err (!%p2642_p12)
}
  0x3c   :  { %33 = dma.hbm_to_vmem [thread:$0]  %s2957_s1, 1024, %s31_s7, [#allocation3]  }
  0x3d   :  { %s2646_s21 = scalar_lea.hbm %s2959_s3, 48 }
  0x3e   :  { %p2647_p13 = scmp.ne.s32.totalorder %s2959_s3, %s2646_s21  ;;  %p2650_p0 = scmp.lt.u32.totalorder %s2646_s21, %s2959_s3 }
  0x40   :  { %p2652_p1 = pnand %p2650_p0, %p2647_p13 }
  0x42   :  { %2655 = shalt.err (!%p2652_p1)
}
  0x43   :  { %s2656_s26 = scalar_lea.vmem %s52_s10, 48  ;;  %s2660_s27 = scalar_lea.vmem %s52_s10, 64 }
  0x44   :  { %p2657_p2 = scmp.ne.s32.totalorder %s52_s10, %s2656_s26  ;;  %p2661_p3 = scmp.lt.s32.totalorder %s52_s10, %s52_s10 }
  0x45   :  { %p2662_p4 = scmp.lt.s32.totalorder %s2660_s27, %s2656_s26 }
  0x47   :  { %p2663_p5 = por %p2662_p4, %p2661_p3 }
  0x49   :  { %p2664_p6 = pnand %p2663_p5, %p2657_p2 }
  0x4b   :  { %2667 = shalt.err (!%p2664_p6)
}
  0x4c   :  { %s2729_s1 = smov 16   ;;  %s2730_s28 = smov 1  }
  0x4d   :  { %57 = dma.hbm_to_vmem [thread:$0]  %s2959_s3, 48, %s52_s10, [#allocation8], %s2729_s1, %s2729_s1, %s2730_s28  }
  0x4e   :  { %s2731_s9 = smov [#allocation12]   ;;  %s2668_s11 = scalar_lea.hbm %s2961_s5, 48 }
  0x4f   :  { %s75_s4 = sshll.u32 %s2731_s9, 4  ;;  %p2669_p7 = scmp.ne.s32.totalorder %s2961_s5, %s2668_s11  ;;  %s76_s4 = int_to_ptr.vmem [resolvable:$true] %s75_s4 }
  0x50   :  { %p2672_p8 = scmp.lt.u32.totalorder %s2668_s11, %s2961_s5 }
  0x52   :  { %p2674_p9 = pnand %p2672_p8, %p2669_p7 }
  0x54   :  { %2677 = shalt.err (!%p2674_p9)
}
  0x55   :  { %s2678_s16 = scalar_lea.vmem %s76_s4, 48  ;;  %s2682_s3 = scalar_lea.vmem %s76_s4, 64 }
  0x56   :  { %p2679_p10 = scmp.ne.s32.totalorder %s76_s4, %s2678_s16  ;;  %p2683_p11 = scmp.lt.s32.totalorder %s76_s4, %s76_s4 }
  0x57   :  { %p2684_p12 = scmp.lt.s32.totalorder %s2682_s3, %s2678_s16 }
  0x59   :  { %p2685_p13 = por %p2684_p12, %p2683_p11 }
  0x5b   :  { %p2686_p0 = pnand %p2685_p13, %p2679_p10 }
  0x5d   :  { %2689 = shalt.err (!%p2686_p0)
}
  0x5e   :  { %81 = dma.hbm_to_vmem [thread:$0]  %s2961_s5, 48, %s76_s4, [#allocation11], %s2729_s1, %s2729_s1, %s2730_s28  }
  0x5f   :  { %2712 = dma.done.wait [#allocation5], 16  }
  0x60   :  { %2713 = vsyncadd [#allocation5], 4294967280 }
  0x61   :  { %2714 = dma.done.wait [#allocation3], 1024  }
  0x62   :  { %2715 = vsyncadd [#allocation3], 4294966272 }
  0x63   :  { %2716 = dma.done.wait [#allocation8], 49200  }
  0x64   :  { %2717 = vsyncadd [#allocation8], 4294918096 }
  0x65   :  { %2718 = dma.done.wait [#allocation11], 6192  }
  0x66   :  { %2719 = vsyncadd [#allocation11], 4294961104 }
  0x67   :  { %100 = sfence }
  0x68   :  { %v163_v0 = vld [vmem:[#allocation7 + $0x80] sm:$0xff]  ;;  %v164_v1 = vld [vmem:[#allocation7 + $0x88] sm:$0xff]  ;;  %v165_v11 = vld [vmem:[#allocation7 + $0x90] sm:$0xff]  ;;  %s2843_s5 = sld [smem:[#allocation2]]  ;;  %s2872_s0 = sld [smem:[#allocation2 + $0x1]]  ;;  %vm2733_vm0 = vmmov 0  }
  0x69   :  { %v147_v2 = vld [vmem:[#allocation7] sm:$0xff]  ;;  %v2111_v3 = vpack.c.bf16 %v164_v1, %v163_v0  ;;  %v148_v4 = vld [vmem:[#allocation7 + $0x8] sm:$0xff]  ;;  %v166_v13 = vld [vmem:[#allocation7 + $0x98] sm:$0xff]  ;;  %s2897_s18 = sld [smem:[#allocation2 + $0x2]]  ;;  %s2735_s19 = smov [#allocation13]  }
  0x6a   :  { %v195_v5 = vld [vmem:[#allocation7 + $0x180] sm:$0xff]  ;;  %v196_v6 = vld [vmem:[#allocation7 + $0x188] sm:$0xff]  ;;  %v2113_v7 = vpack.c.bf16 %v148_v4, %v147_v2  ;;  %v149_v14 = vld [vmem:[#allocation7 + $0x10] sm:$0xff]  ;;  %v2115_v16 = vpack.c.bf16 %v166_v13, %v165_v11  ;;  %s1590_s20 = sshll.u32 %s2735_s19, 4  ;;  %s1591_s20 = int_to_ptr.vmem [resolvable:$true] %s1590_s20 }
  0x6b   :  { %v2143_v8 = vpack.c.bf16 %v196_v6, %v195_v5  ;;  %v179_v9 = vld [vmem:[#allocation7 + $0x100] sm:$0xff]  ;;  %v180_v10 = vld [vmem:[#allocation7 + $0x108] sm:$0xff]  ;;  %2112 = vmatprep.subr.bf16.mxu0 %v2111_v3  ;;  %v150_v15 = vld [vmem:[#allocation7 + $0x18] sm:$0xff]  ;;  %s2690_s2 = scalar_lea.vmem %s1591_s20, 128  ;;  %p2695_p2 = scmp.lt.s32.totalorder %s1591_s20, %s1591_s20 }
  0x6c   :  { %v2145_v12 = vpack.c.bf16 %v180_v10, %v179_v9  ;;  %2114 = vmatpush3.bf16.msra.mxu0 %v2113_v7  ;;  %v2117_v17 = vpack.c.bf16 %v150_v15, %v149_v14  ;;  %v197_v18 = vld [vmem:[#allocation7 + $0x190] sm:$0xff]  ;;  %v198_v19 = vld [vmem:[#allocation7 + $0x198] sm:$0xff]  ;;  %v167_v23 = vld [vmem:[#allocation7 + $0xa0] sm:$0xff]  ;;  %p2691_p1 = scmp.ne.s32.totalorder %s1591_s20, %s2690_s2  ;;  %p2696_p3 = scmp.lt.s32.totalorder %s2690_s2, %s2690_s2 }
  0x6d   :  { %2144 = vmatprep.subr.bf16.mxu1 %v2143_v8  ;;  %v181_v20 = vld [vmem:[#allocation7 + $0x110] sm:$0xff]  ;;  %v2147_v21 = vpack.c.bf16 %v198_v19, %v197_v18  ;;  %v182_v22 = vld [vmem:[#allocation7 + $0x118] sm:$0xff]  ;;  %v168_v24 = vld [vmem:[#allocation7 + $0xa8] sm:$0xff]  ;;  %2116 = vmatprep.subr.bf16.mxu0 %v2115_v16 }
  0x6e   :  { %2146 = vmatpush3.bf16.msra.mxu1 %v2145_v12  ;;  %v2149_v25 = vpack.c.bf16 %v182_v22, %v181_v20  ;;  %v2119_v26 = vpack.c.bf16 %v168_v24, %v167_v23  ;;  %v151_v27 = vld [vmem:[#allocation7 + $0x20] sm:$0xff]  ;;  %v152_v28 = vld [vmem:[#allocation7 + $0x28] sm:$0xff]  ;;  %v169_v35 = vld [vmem:[#allocation7 + $0xb0] sm:$0xff]  ;;  %v2846_v10 = vstv %s2843_s5  ;;  %p2697_p4 = por %p2696_p3, %p2695_p2 }
  0x6f   :  { %v199_v29 = vld [vmem:[#allocation7 + $0x1a0] sm:$0xff]  ;;  %2148 = vmatprep.subr.bf16.mxu1 %v2147_v21  ;;  %v200_v30 = vld [vmem:[#allocation7 + $0x1a8] sm:$0xff]  ;;  %v2121_v33 = vpack.c.bf16 %v152_v28, %v151_v27  ;;  %v170_v36 = vld [vmem:[#allocation7 + $0xb8] sm:$0xff] }
  0x70   :  { %v183_v31 = vld [vmem:[#allocation7 + $0x120] sm:$0xff]  ;;  %v184_v32 = vld [vmem:[#allocation7 + $0x128] sm:$0xff]  ;;  %2118 = vmatpush3.bf16.msra.mxu0 %v2117_v17  ;;  %v2151_v34 = vpack.c.bf16 %v200_v30, %v199_v29  ;;  %v153_v37 = vld [vmem:[#allocation7 + $0x30] sm:$0xff]  ;;  %v2123_v39 = vpack.c.bf16 %v170_v36, %v169_v35  ;;  %p2698_p5 = pnand %p2697_p4, %p2691_p1 }
  0x71   :  { %2120 = vmatprep.subr.bf16.mxu0 %v2119_v26  ;;  %v2153_v38 = vpack.c.bf16 %v184_v32, %v183_v31  ;;  %v154_v40 = vld [vmem:[#allocation7 + $0x38] sm:$0xff]  ;;  %v201_v41 = vld [vmem:[#allocation7 + $0x1b0] sm:$0xff]  ;;  %v171_v46 = vld [vmem:[#allocation7 + $0xc0] sm:$0xff] }
  0x72   :  { %2150 = vmatpush3.bf16.msra.mxu1 %v2149_v25  ;;  %v202_v42 = vld [vmem:[#allocation7 + $0x1b8] sm:$0xff]  ;;  %v185_v44 = vld [vmem:[#allocation7 + $0x130] sm:$0xff]  ;;  %v172_v47 = vld [vmem:[#allocation7 + $0xc8] sm:$0xff]  ;;  %v2125_v48 = vpack.c.bf16 %v154_v40, %v153_v37 }
  0x73   :  { %2152 = vmatprep.subr.bf16.mxu1 %v2151_v34  ;;  %v2155_v43 = vpack.c.bf16 %v202_v42, %v201_v41  ;;  %v186_v45 = vld [vmem:[#allocation7 + $0x138] sm:$0xff]  ;;  %v203_v49 = vld [vmem:[#allocation7 + $0x1c0] sm:$0xff]  ;;  %v204_v50 = vld [vmem:[#allocation7 + $0x1c8] sm:$0xff]  ;;  %v2127_v52 = vpack.c.bf16 %v172_v47, %v171_v46 }
  0x74   :  { %2122 = vmatpush3.bf16.msra.mxu0 %v2121_v33  ;;  %v2157_v51 = vpack.c.bf16 %v186_v45, %v185_v44  ;;  %v155_v53 = vld [vmem:[#allocation7 + $0x40] sm:$0xff]  ;;  %v156_v54 = vld [vmem:[#allocation7 + $0x48] sm:$0xff]  ;;  %v2159_v56 = vpack.c.bf16 %v204_v50, %v203_v49  ;;  %v173_v58 = vld [vmem:[#allocation7 + $0xd0] sm:$0xff] }
  0x75   :  { %2124 = vmatprep.subr.bf16.mxu0 %v2123_v39  ;;  %v187_v55 = vld [vmem:[#allocation7 + $0x140] sm:$0xff]  ;;  %v188_v57 = vld [vmem:[#allocation7 + $0x148] sm:$0xff]  ;;  %v174_v59 = vld [vmem:[#allocation7 + $0xd8] sm:$0xff]  ;;  %v2129_v62 = vpack.c.bf16 %v156_v54, %v155_v53 }
  0x76   :  { %2154 = vmatpush3.bf16.msra.mxu1 %v2153_v38  ;;  %v205_v60 = vld [vmem:[#allocation7 + $0x1d0] sm:$0xff]  ;;  %v206_v61 = vld [vmem:[#allocation7 + $0x1d8] sm:$0xff]  ;;  %v2161_v63 = vpack.c.bf16 %v188_v57, %v187_v55  ;;  %v2131_v0 = vpack.c.bf16 %v174_v59, %v173_v58  ;;  %v175_v6 = vld [vmem:[#allocation7 + $0xe0] sm:$0xff] }
  0x77   :  { %2156 = vmatprep.subr.bf16.mxu1 %v2155_v43  ;;  %v157_v1 = vld [vmem:[#allocation7 + $0x50] sm:$0xff]  ;;  %v158_v2 = vld [vmem:[#allocation7 + $0x58] sm:$0xff]  ;;  %v2163_v4 = vpack.c.bf16 %v206_v61, %v205_v60  ;;  %v176_v7 = vld [vmem:[#allocation7 + $0xe8] sm:$0xff] }
  0x78   :  { %2126 = vmatpush3.bf16.msra.mxu0 %v2125_v48  ;;  %v189_v3 = vld [vmem:[#allocation7 + $0x150] sm:$0xff]  ;;  %v190_v5 = vld [vmem:[#allocation7 + $0x158] sm:$0xff]  ;;  %v207_v8 = vld [vmem:[#allocation7 + $0x1e0] sm:$0xff]  ;;  %v2133_v11 = vpack.c.bf16 %v158_v2, %v157_v1  ;;  %v2135_v15 = vpack.c.bf16 %v176_v7, %v175_v6 }
  0x79   :  { %2128 = vmatprep.subr.bf16.mxu0 %v2127_v52  ;;  %v208_v9 = vld [vmem:[#allocation7 + $0x1e8] sm:$0xff]  ;;  %v159_v12 = vld [vmem:[#allocation7 + $0x60] sm:$0xff]  ;;  %v2165_v14 = vpack.c.bf16 %v190_v5, %v189_v3  ;;  %v177_v20 = vld [vmem:[#allocation7 + $0xf0] sm:$0xff] }
  0x7a   :  { %2158 = vmatpush3.bf16.msra.mxu1 %v2157_v51  ;;  %v160_v13 = vld [vmem:[#allocation7 + $0x68] sm:$0xff]  ;;  %v191_v16 = vld [vmem:[#allocation7 + $0x160] sm:$0xff]  ;;  %v2167_v19 = vpack.c.bf16 %v208_v9, %v207_v8  ;;  %v178_v21 = vld [vmem:[#allocation7 + $0xf8] sm:$0xff] }
  0x7b   :  { %2160 = vmatprep.subr.bf16.mxu1 %v2159_v56  ;;  %v192_v17 = vld [vmem:[#allocation7 + $0x168] sm:$0xff]  ;;  %v2852_v23 = vld [vmem:[#allocation6 + $0x18] sm:$0xff]  ;;  %v209_v24 = vld [vmem:[#allocation7 + $0x1f0] sm:$0xff]  ;;  %v2137_v27 = vpack.c.bf16 %v160_v13, %v159_v12  ;;  %v2139_v29 = vpack.c.bf16 %v178_v21, %v177_v20 }
  0x7c   :  { %2130 = vmatpush3.bf16.msra.mxu0 %v2129_v62  ;;  %v2848_v18 = vld [vmem:[#allocation6 + $0x8] sm:$0xff]  ;;  %v210_v25 = vld [vmem:[#allocation7 + $0x1f8] sm:$0xff]  ;;  %v116_v26 = vmul.f32 %v2846_v10, %v2852_v23  ;;  %v2169_v28 = vpack.c.bf16 %v192_v17, %v191_v16  ;;  %v161_v30 = vld [vmem:[#allocation7 + $0x70] sm:$0xff] }
  0x7d   :  { %2132 = vmatprep.subr.bf16.mxu0 %v2131_v0  ;;  %v114_v22 = vmul.f32 %v2846_v10, %v2848_v18  ;;  %v162_v31 = vld [vmem:[#allocation7 + $0x78] sm:$0xff]  ;;  %v193_v32 = vld [vmem:[#allocation7 + $0x170] sm:$0xff]  ;;  %v2171_v33 = vpack.c.bf16 %v210_v25, %v209_v24  ;;  %v227_v35 = vld [vmem:[#allocation7 + $0x280] sm:$0xff] }
  0x7e   :  { %2162 = vmatpush3.bf16.msra.mxu1 %v2161_v63  ;;  %v194_v34 = vld [vmem:[#allocation7 + $0x178] sm:$0xff]  ;;  %v228_v36 = vld [vmem:[#allocation7 + $0x288] sm:$0xff]  ;;  %671 = vmatprep.mubr.f32.mxu1 %v116_v26  ;;  %v259_v37 = vld [vmem:[#allocation7 + $0x380] sm:$0xff]  ;;  %v2141_v39 = vpack.c.bf16 %v162_v31, %v161_v30 }
  0x7f   :  { %2164 = vmatprep.subr.bf16.mxu1 %v2163_v4  ;;  %601 = vmatprep.mubr.f32.mxu0 %v114_v22  ;;  %v260_v38 = vld [vmem:[#allocation7 + $0x388] sm:$0xff]  ;;  %v2856_v40 = vld [vmem:[#allocation6] sm:$0xff]  ;;  %v2173_v42 = vpack.c.bf16 %v194_v34, %v193_v32  ;;  %v2175_v43 = vpack.c.bf16 %v228_v36, %v227_v35  ;;  %v2858_v45 = vld [vmem:[#allocation6 + $0x10] sm:$0xff] }
  0x80   :  { %2134 = vmatpush3.bf16.msra.mxu0 %v2133_v11  ;;  %v211_v41 = vld [vmem:[#allocation7 + $0x200] sm:$0xff]  ;;  %v212_v44 = vld [vmem:[#allocation7 + $0x208] sm:$0xff]  ;;  %v2207_v47 = vpack.c.bf16 %v260_v38, %v259_v37  ;;  %v229_v49 = vld [vmem:[#allocation7 + $0x290] sm:$0xff]  ;;  %v113_v51 = vmul.f32 %v2846_v10, %v2856_v40  ;;  %v115_v55 = vmul.f32 %v2846_v10, %v2858_v45 }
  0x81   :  { %2136 = vmatprep.subr.bf16.mxu0 %v2135_v15  ;;  %v243_v46 = vld [vmem:[#allocation7 + $0x300] sm:$0xff]  ;;  %v244_v48 = vld [vmem:[#allocation7 + $0x308] sm:$0xff]  ;;  %v230_v50 = vld [vmem:[#allocation7 + $0x298] sm:$0xff]  ;;  %v2177_v54 = vpack.c.bf16 %v212_v44, %v211_v41 }
  0x82   :  { %2166 = vmatpush3.bf16.msra.mxu1 %v2165_v14  ;;  %v261_v52 = vld [vmem:[#allocation7 + $0x390] sm:$0xff]  ;;  %v262_v53 = vld [vmem:[#allocation7 + $0x398] sm:$0xff]  ;;  %v2209_v56 = vpack.c.bf16 %v244_v48, %v243_v46  ;;  %v2179_v57 = vpack.c.bf16 %v230_v50, %v229_v49  ;;  %v231_v63 = vld [vmem:[#allocation7 + $0x2a0] sm:$0xff] }
  0x83   :  { %2168 = vmatprep.subr.bf16.mxu1 %v2167_v19  ;;  %v213_v58 = vld [vmem:[#allocation7 + $0x210] sm:$0xff]  ;;  %v214_v59 = vld [vmem:[#allocation7 + $0x218] sm:$0xff]  ;;  %v2211_v61 = vpack.c.bf16 %v262_v53, %v261_v52  ;;  %v232_v0 = vld [vmem:[#allocation7 + $0x2a8] sm:$0xff] }
  0x84   :  { %2138 = vmatpush3.bf16.msra.mxu0 %v2137_v27  ;;  %v245_v60 = vld [vmem:[#allocation7 + $0x310] sm:$0xff]  ;;  %v246_v62 = vld [vmem:[#allocation7 + $0x318] sm:$0xff]  ;;  %v263_v1 = vld [vmem:[#allocation7 + $0x3a0] sm:$0xff]  ;;  %v2181_v3 = vpack.c.bf16 %v214_v59, %v213_v58  ;;  %v2183_v5 = vpack.c.bf16 %v232_v0, %v231_v63 }
  0x85   :  { %2140 = vmatprep.subr.bf16.mxu0 %v2139_v29  ;;  %v264_v2 = vld [vmem:[#allocation7 + $0x3a8] sm:$0xff]  ;;  %v2213_v4 = vpack.c.bf16 %v246_v62, %v245_v60  ;;  %v215_v6 = vld [vmem:[#allocation7 + $0x220] sm:$0xff]  ;;  %v233_v12 = vld [vmem:[#allocation7 + $0x2b0] sm:$0xff] }
  0x86   :  { %2170 = vmatpush3.bf16.msra.mxu1 %v2169_v28  ;;  %v216_v7 = vld [vmem:[#allocation7 + $0x228] sm:$0xff]  ;;  %v247_v8 = vld [vmem:[#allocation7 + $0x320] sm:$0xff]  ;;  %v2215_v9 = vpack.c.bf16 %v264_v2, %v263_v1  ;;  %v234_v13 = vld [vmem:[#allocation7 + $0x2b8] sm:$0xff] }
  0x87   :  { %2172 = vmatprep.subr.bf16.mxu1 %v2171_v33  ;;  %v248_v11 = vld [vmem:[#allocation7 + $0x328] sm:$0xff]  ;;  %v265_v14 = vld [vmem:[#allocation7 + $0x3b0] sm:$0xff]  ;;  %v266_v15 = vld [vmem:[#allocation7 + $0x3b8] sm:$0xff]  ;;  %v2185_v16 = vpack.c.bf16 %v216_v7, %v215_v6  ;;  %v2187_v19 = vpack.c.bf16 %v234_v13, %v233_v12 }
  0x88   :  { %2142 = vmatpush3.bf16.msra.mxu0 %v2141_v39  ;;  %v2217_v17 = vpack.c.bf16 %v248_v11, %v247_v8  ;;  %v217_v20 = vld [vmem:[#allocation7 + $0x230] sm:$0xff]  ;;  %v218_v21 = vld [vmem:[#allocation7 + $0x238] sm:$0xff]  ;;  %v2219_v24 = vpack.c.bf16 %v266_v15, %v265_v14  ;;  %v235_v26 = vld [vmem:[#allocation7 + $0x2c0] sm:$0xff] }
  0x89   :  { %2176 = vmatprep.subr.bf16.mxu0 %v2175_v43  ;;  %v249_v22 = vld [vmem:[#allocation7 + $0x330] sm:$0xff]  ;;  %v250_v25 = vld [vmem:[#allocation7 + $0x338] sm:$0xff]  ;;  %v236_v27 = vld [vmem:[#allocation7 + $0x2c8] sm:$0xff]  ;;  %v2189_v30 = vpack.c.bf16 %v218_v21, %v217_v20 }
  0x8a   :  { %2174 = vmatpush3.bf16.msra.mxu1 %v2173_v42  ;;  %v267_v28 = vld [vmem:[#allocation7 + $0x3c0] sm:$0xff]  ;;  %v268_v29 = vld [vmem:[#allocation7 + $0x3c8] sm:$0xff]  ;;  %v2221_v33 = vpack.c.bf16 %v250_v25, %v249_v22  ;;  %v2191_v34 = vpack.c.bf16 %v236_v27, %v235_v26  ;;  %v2868_v38 = vld [vmem:[#allocation6 + $0x38] sm:$0xff] }
  0x8b   :  { %2208 = vmatprep.subr.bf16.mxu1 %v2207_v47  ;;  %602 = vmatmul.mubr.f32.vlgmr.msra.gmra.mrb[0].mxu0 %v113_v51  ;;  %v219_v31 = vld [vmem:[#allocation7 + $0x240] sm:$0xff]  ;;  %v2864_v32 = vld [vmem:[#allocation6 + $0x28] sm:$0xff]  ;;  %v2223_v39 = vpack.c.bf16 %v268_v29, %v267_v28  ;;  %v237_v42 = vld [vmem:[#allocation7 + $0x2d0] sm:$0xff]  ;;  %v120_v44 = vmul.f32 %v2846_v10, %v2868_v38 }
  0x8c   :  { %2178 = vmatpush3.bf16.msra.mxu0 %v2177_v54  ;;  %v220_v35 = vld [vmem:[#allocation7 + $0x248] sm:$0xff]  ;;  %v251_v36 = vld [vmem:[#allocation7 + $0x340] sm:$0xff]  ;;  %v118_v37 = vmul.f32 %v2846_v10, %v2864_v32  ;;  %v238_v43 = vld [vmem:[#allocation7 + $0x2d8] sm:$0xff] }
  0x8d   :  { %672 = vmatmul.mubr.f32.vlgmr.msra.gmra.mrb[0].mxu1 %v115_v55  ;;  %2180 = vmatprep.subr.bf16.mxu0 %v2179_v57  ;;  %v252_v41 = vld [vmem:[#allocation7 + $0x348] sm:$0xff]  ;;  %v269_v46 = vld [vmem:[#allocation7 + $0x3d0] sm:$0xff]  ;;  %v270_v47 = vld [vmem:[#allocation7 + $0x3d8] sm:$0xff]  ;;  %v2193_v48 = vpack.c.bf16 %v220_v35, %v219_v31  ;;  %v2195_v50 = vpack.c.bf16 %v238_v43, %v237_v42 }
  0x8e   :  { %2210 = vmatpush3.bf16.msra.mxu1 %v2209_v56  ;;  %741 = vmatprep.mubr.f32.mxu0 %v118_v37  ;;  %v2225_v49 = vpack.c.bf16 %v252_v41, %v251_v36  ;;  %v221_v51 = vld [vmem:[#allocation7 + $0x250] sm:$0xff]  ;;  %v222_v52 = vld [vmem:[#allocation7 + $0x258] sm:$0xff]  ;;  %v2227_v54 = vpack.c.bf16 %v270_v47, %v269_v46  ;;  %v239_v56 = vld [vmem:[#allocation7 + $0x2e0] sm:$0xff]  ;;  %v2881_v41 = vstv %s2872_s0 }
  0x8f   :  { %2212 = vmatprep.subr.bf16.mxu1 %v2211_v61  ;;  %811 = vmatprep.mubr.f32.mxu1 %v120_v44  ;;  %v253_v53 = vld [vmem:[#allocation7 + $0x350] sm:$0xff]  ;;  %v254_v55 = vld [vmem:[#allocation7 + $0x358] sm:$0xff]  ;;  %v240_v57 = vld [vmem:[#allocation7 + $0x2e8] sm:$0xff]  ;;  %v2197_v60 = vpack.c.bf16 %v222_v52, %v221_v51 }
  0x90   :  { %2182 = vmatpush3.bf16.msra.mxu0 %v2181_v3  ;;  %v271_v58 = vld [vmem:[#allocation7 + $0x3e0] sm:$0xff]  ;;  %v272_v59 = vld [vmem:[#allocation7 + $0x3e8] sm:$0xff]  ;;  %v2229_v61 = vpack.c.bf16 %v254_v55, %v253_v53  ;;  %v2199_v62 = vpack.c.bf16 %v240_v57, %v239_v56  ;;  %v273_v6 = vld [vmem:[#allocation7 + $0x3f0] sm:$0xff]  ;;  %v125_v57 = vmul.f32 %v2881_v41, %v2852_v23 }
  0x91   :  { %2184 = vmatprep.subr.bf16.mxu0 %v2183_v5  ;;  %v223_v63 = vld [vmem:[#allocation7 + $0x260] sm:$0xff]  ;;  %v224_v0 = vld [vmem:[#allocation7 + $0x268] sm:$0xff]  ;;  %v2231_v2 = vpack.c.bf16 %v272_v59, %v271_v58  ;;  %v242_v5 = vld [vmem:[#allocation7 + $0x2f8] sm:$0xff] }
  0x92   :  { %2214 = vmatpush3.bf16.msra.mxu1 %v2213_v4  ;;  %v255_v1 = vld [vmem:[#allocation7 + $0x360] sm:$0xff]  ;;  %v256_v3 = vld [vmem:[#allocation7 + $0x368] sm:$0xff]  ;;  %v241_v4 = vld [vmem:[#allocation7 + $0x2f0] sm:$0xff]  ;;  %v2201_v8 = vpack.c.bf16 %v224_v0, %v223_v63 }
  0x93   :  { %2216 = vmatprep.subr.bf16.mxu1 %v2215_v9  ;;  %v274_v7 = vld [vmem:[#allocation7 + $0x3f8] sm:$0xff]  ;;  %v2233_v9 = vpack.c.bf16 %v256_v3, %v255_v1  ;;  %v2203_v11 = vpack.c.bf16 %v242_v5, %v241_v4  ;;  %v225_v12 = vld [vmem:[#allocation7 + $0x270] sm:$0xff]  ;;  %v323_v20 = vld [vmem:[#allocation7 + $0x580] sm:$0xff] }
  0x94   :  { %2186 = vmatpush3.bf16.msra.mxu0 %v2185_v16  ;;  %v226_v13 = vld [vmem:[#allocation7 + $0x278] sm:$0xff]  ;;  %v257_v14 = vld [vmem:[#allocation7 + $0x370] sm:$0xff]  ;;  %v2235_v15 = vpack.c.bf16 %v274_v7, %v273_v6  ;;  %v324_v21 = vld [vmem:[#allocation7 + $0x588] sm:$0xff] }
  0x95   :  { %2188 = vmatprep.subr.bf16.mxu0 %v2187_v19  ;;  %v258_v16 = vld [vmem:[#allocation7 + $0x378] sm:$0xff]  ;;  %v292_v19 = vld [vmem:[#allocation7 + $0x488] sm:$0xff]  ;;  %v2205_v22 = vpack.c.bf16 %v226_v13, %v225_v12  ;;  %v275_v25 = vld [vmem:[#allocation7 + $0x400] sm:$0xff]  ;;  %v2271_v31 = vpack.c.bf16 %v324_v21, %v323_v20 }
  0x96   :  { %2218 = vmatpush3.bf16.msra.mxu1 %v2217_v17  ;;  %v291_v17 = vld [vmem:[#allocation7 + $0x480] sm:$0xff]  ;;  %v2237_v26 = vpack.c.bf16 %v258_v16, %v257_v14  ;;  %v276_v28 = vld [vmem:[#allocation7 + $0x408] sm:$0xff]  ;;  %v2876_v29 = vld [vmem:[#allocation6 + $0x30] sm:$0xff] }
  0x97   :  { %2220 = vmatprep.subr.bf16.mxu1 %v2219_v24  ;;  %v2874_v24 = vld [vmem:[#allocation6 + $0x20] sm:$0xff]  ;;  %v2239_v27 = vpack.c.bf16 %v292_v19, %v291_v17  ;;  %v294_v35 = vld [vmem:[#allocation7 + $0x498] sm:$0xff]  ;;  %v325_v37 = vld [vmem:[#allocation7 + $0x590] sm:$0xff]  ;;  %v2241_v42 = vpack.c.bf16 %v276_v28, %v275_v25  ;;  %v119_v43 = vmul.f32 %v2846_v10, %v2876_v29 }
  0x98   :  { %2190 = vmatpush3.bf16.msra.mxu0 %v2189_v30  ;;  %v307_v30 = vld [vmem:[#allocation7 + $0x500] sm:$0xff]  ;;  %v117_v36 = vmul.f32 %v2846_v10, %v2874_v24  ;;  %v277_v47 = vld [vmem:[#allocation7 + $0x410] sm:$0xff]  ;;  %v310_v51 = vld [vmem:[#allocation7 + $0x518] sm:$0xff] }
  0x99   :  { %2192 = vmatprep.subr.bf16.mxu0 %v2191_v34  ;;  %v293_v34 = vld [vmem:[#allocation7 + $0x490] sm:$0xff]  ;;  %v295_v52 = vld [vmem:[#allocation7 + $0x4a0] sm:$0xff]  ;;  %v296_v53 = vld [vmem:[#allocation7 + $0x4a8] sm:$0xff] }
  0x9a   :  { %2222 = vmatpush3.bf16.msra.mxu1 %v2221_v33  ;;  %v308_v33 = vld [vmem:[#allocation7 + $0x508] sm:$0xff]  ;;  %v2243_v46 = vpack.c.bf16 %v294_v35, %v293_v34  ;;  %v327_v55 = vld [vmem:[#allocation7 + $0x5a0] sm:$0xff]  ;;  %v298_v3 = vld [vmem:[#allocation7 + $0x4b8] sm:$0xff] }
  0x9b   :  { %2224 = vmatprep.subr.bf16.mxu1 %v2223_v39  ;;  %v326_v39 = vld [vmem:[#allocation7 + $0x598] sm:$0xff]  ;;  %v2273_v44 = vpack.c.bf16 %v308_v33, %v307_v30  ;;  %v328_v56 = vld [vmem:[#allocation7 + $0x5a8] sm:$0xff]  ;;  %v311_v63 = vld [vmem:[#allocation7 + $0x520] sm:$0xff] }
  0x9c   :  { %2194 = vmatpush3.bf16.msra.mxu0 %v2193_v48  ;;  %v278_v48 = vld [vmem:[#allocation7 + $0x418] sm:$0xff]  ;;  %v2279_v0 = vpack.c.bf16 %v328_v56, %v327_v55  ;;  %v312_v1 = vld [vmem:[#allocation7 + $0x528] sm:$0xff]  ;;  %v329_v4 = vld [vmem:[#allocation7 + $0x5b0] sm:$0xff] }
  0x9d   :  { %2196 = vmatprep.subr.bf16.mxu0 %v2195_v50  ;;  %v2275_v50 = vpack.c.bf16 %v326_v39, %v325_v37  ;;  %v2245_v58 = vpack.c.bf16 %v278_v48, %v277_v47  ;;  %v330_v5 = vld [vmem:[#allocation7 + $0x5b8] sm:$0xff]  ;;  %v2281_v7 = vpack.c.bf16 %v312_v1, %v311_v63  ;;  %v313_v12 = vld [vmem:[#allocation7 + $0x530] sm:$0xff]  ;;  %v300_v16 = vld [vmem:[#allocation7 + $0x4c8] sm:$0xff] }
  0x9e   :  { %2226 = vmatpush3.bf16.msra.mxu1 %v2225_v49  ;;  %v309_v49 = vld [vmem:[#allocation7 + $0x510] sm:$0xff]  ;;  %v2283_v13 = vpack.c.bf16 %v330_v5, %v329_v4  ;;  %v314_v14 = vld [vmem:[#allocation7 + $0x538] sm:$0xff]  ;;  %v331_v17 = vld [vmem:[#allocation7 + $0x5c0] sm:$0xff] }
  0x9f   :  { %2228 = vmatprep.subr.bf16.mxu1 %v2227_v54  ;;  %v123_v54 = vmul.f32 %v2881_v41, %v2848_v18  ;;  %v2277_v59 = vpack.c.bf16 %v310_v51, %v309_v49  ;;  %v332_v19 = vld [vmem:[#allocation7 + $0x5c8] sm:$0xff]  ;;  %v2285_v21 = vpack.c.bf16 %v314_v14, %v313_v12  ;;  %v283_v25 = vld [vmem:[#allocation7 + $0x440] sm:$0xff]  ;;  %v302_v33 = vld [vmem:[#allocation7 + $0x4d8] sm:$0xff] }
  0xa0   :  { %2198 = vmatpush3.bf16.msra.mxu0 %v2197_v60  ;;  %v2247_v60 = vpack.c.bf16 %v296_v53, %v295_v52  ;;  %v2287_v28 = vpack.c.bf16 %v332_v19, %v331_v17  ;;  %v316_v30 = vld [vmem:[#allocation7 + $0x548] sm:$0xff]  ;;  %v333_v34 = vld [vmem:[#allocation7 + $0x5d0] sm:$0xff]  ;;  %v334_v35 = vld [vmem:[#allocation7 + $0x5d8] sm:$0xff] }
  0xa1   :  { %2200 = vmatprep.subr.bf16.mxu0 %v2199_v62  ;;  %v280_v62 = vld [vmem:[#allocation7 + $0x428] sm:$0xff]  ;;  %v318_v47 = vld [vmem:[#allocation7 + $0x558] sm:$0xff]  ;;  %v303_v48 = vld [vmem:[#allocation7 + $0x4e0] sm:$0xff] }
  0xa2   :  { %2230 = vmatpush3.bf16.msra.mxu1 %v2229_v61  ;;  %v279_v61 = vld [vmem:[#allocation7 + $0x420] sm:$0xff]  ;;  %v304_v49 = vld [vmem:[#allocation7 + $0x4e8] sm:$0xff]  ;;  %v338_v63 = vld [vmem:[#allocation7 + $0x5f8] sm:$0xff] }
  0xa3   :  { %2232 = vmatprep.subr.bf16.mxu1 %v2231_v2  ;;  %v297_v2 = vld [vmem:[#allocation7 + $0x4b0] sm:$0xff]  ;;  %v2249_v6 = vpack.c.bf16 %v280_v62, %v279_v61  ;;  %v336_v51 = vld [vmem:[#allocation7 + $0x5e8] sm:$0xff]  ;;  %v287_v55 = vld [vmem:[#allocation7 + $0x460] sm:$0xff] }
  0xa4   :  { %2202 = vmatpush3.bf16.msra.mxu0 %v2201_v8  ;;  %v2251_v8 = vpack.c.bf16 %v298_v3, %v297_v2  ;;  %v288_v56 = vld [vmem:[#allocation7 + $0x468] sm:$0xff]  ;;  %v306_v61 = vld [vmem:[#allocation7 + $0x4f8] sm:$0xff]  ;;  %v337_v62 = vld [vmem:[#allocation7 + $0x5f0] sm:$0xff] }
  0xa5   :  { %2204 = vmatprep.subr.bf16.mxu0 %v2203_v11  ;;  %v282_v11 = vld [vmem:[#allocation7 + $0x438] sm:$0xff]  ;;  %v289_v3 = vld [vmem:[#allocation7 + $0x470] sm:$0xff]  ;;  %v388_v12 = vld [vmem:[#allocation7 + $0x788] sm:$0xff] }
  0xa6   :  { %2234 = vmatpush3.bf16.msra.mxu1 %v2233_v9  ;;  %v281_v9 = vld [vmem:[#allocation7 + $0x430] sm:$0xff]  ;;  %v290_v4 = vld [vmem:[#allocation7 + $0x478] sm:$0xff]  ;;  %v340_v17 = vld [vmem:[#allocation7 + $0x608] sm:$0xff] }
  0xa7   :  { %2236 = vmatprep.subr.bf16.mxu1 %v2235_v15  ;;  %v299_v15 = vld [vmem:[#allocation7 + $0x4c0] sm:$0xff]  ;;  %v2253_v20 = vpack.c.bf16 %v282_v11, %v281_v9  ;;  %v321_v5 = vld [vmem:[#allocation7 + $0x570] sm:$0xff]  ;;  %v356_v9 = vld [vmem:[#allocation7 + $0x688] sm:$0xff] }
  0xa8   :  { %2206 = vmatpush3.bf16.msra.mxu0 %v2205_v22  ;;  %v2255_v22 = vpack.c.bf16 %v300_v16, %v299_v15  ;;  %v387_v11 = vld [vmem:[#allocation7 + $0x780] sm:$0xff] }
  0xa9   :  { %2240 = vmatprep.subr.bf16.mxu0 %v2239_v27  ;;  %v315_v27 = vld [vmem:[#allocation7 + $0x540] sm:$0xff] }
  0xaa   :  { %2238 = vmatpush3.bf16.msra.mxu1 %v2237_v26  ;;  %v284_v26 = vld [vmem:[#allocation7 + $0x448] sm:$0xff]  ;;  %v2289_v37 = vpack.c.bf16 %v316_v30, %v315_v27  ;;  %v339_v16 = vld [vmem:[#allocation7 + $0x600] sm:$0xff]  ;;  %v389_v27 = vld [vmem:[#allocation7 + $0x790] sm:$0xff] }
  0xab   :  { %2272 = vmatprep.subr.bf16.mxu1 %v2271_v31  ;;  %742 = vmatmul.mubr.f32.vlgmr.msra.gmra.mrb[2].mxu0 %v117_v36  ;;  %v301_v31 = vld [vmem:[#allocation7 + $0x4d0] sm:$0xff]  ;;  %v2257_v36 = vpack.c.bf16 %v284_v26, %v283_v25  ;;  %v371_v19 = vld [vmem:[#allocation7 + $0x700] sm:$0xff]  ;;  %v358_v25 = vld [vmem:[#allocation7 + $0x698] sm:$0xff]  ;;  %v122_v26 = vmul.f32 %v2881_v41, %v2856_v40  ;;  %v2305_v30 = vpack.c.bf16 %v340_v17, %v339_v16 }
  0xac   :  { %2242 = vmatpush3.bf16.msra.mxu0 %v2241_v42  ;;  %881 = vmatprep.mubr.f32.mxu0 %v123_v54  ;;  %v2259_v39 = vpack.c.bf16 %v302_v33, %v301_v31  ;;  %v285_v42 = vld [vmem:[#allocation7 + $0x450] sm:$0xff]  ;;  %v2263_v54 = vpack.c.bf16 %v304_v49, %v303_v48  ;;  %v124_v31 = vmul.f32 %v2881_v41, %v2858_v45  ;;  %v366_v17 = vld [vmem:[#allocation7 + $0x6d8] sm:$0xff] }
  0xad   :  { %812 = vmatmul.mubr.f32.vlgmr.msra.gmra.mrb[2].mxu1 %v119_v43  ;;  %2244 = vmatprep.subr.bf16.mxu0 %v2243_v46  ;;  %v286_v43 = vld [vmem:[#allocation7 + $0x458] sm:$0xff]  ;;  %v2291_v46 = vpack.c.bf16 %v334_v35, %v333_v34  ;;  %v341_v35 = vld [vmem:[#allocation7 + $0x610] sm:$0xff]  ;;  %v127_v40 = vmul.f32 %v2881_v41, %v2864_v32  ;;  %v129_v45 = vmul.f32 %v2881_v41, %v2868_v38 }
  0xae   :  { %2274 = vmatpush3.bf16.msra.mxu1 %v2273_v44  ;;  %951 = vmatprep.mubr.f32.mxu1 %v125_v57  ;;  %v317_v44 = vld [vmem:[#allocation7 + $0x550] sm:$0xff]  ;;  %v2261_v52 = vpack.c.bf16 %v286_v43, %v285_v42  ;;  %v319_v57 = vld [vmem:[#allocation7 + $0x560] sm:$0xff]  ;;  %v374_v42 = vld [vmem:[#allocation7 + $0x718] sm:$0xff] }
  0xaf   :  { %2276 = vmatprep.subr.bf16.mxu1 %v2275_v50  ;;  %v335_v50 = vld [vmem:[#allocation7 + $0x5e0] sm:$0xff]  ;;  %v2293_v53 = vpack.c.bf16 %v318_v47, %v317_v44  ;;  %v360_v44 = vld [vmem:[#allocation7 + $0x6a8] sm:$0xff]  ;;  %v361_v32 = vld [vmem:[#allocation7 + $0x6b0] sm:$0xff] }
  0xb0   :  { %2246 = vmatpush3.bf16.msra.mxu0 %v2245_v58  ;;  %v2295_v58 = vpack.c.bf16 %v336_v51, %v335_v50  ;;  %v359_v43 = vld [vmem:[#allocation7 + $0x6a0] sm:$0xff]  ;;  %v392_v47 = vld [vmem:[#allocation7 + $0x7a8] sm:$0xff]  ;;  %v365_v16 = vld [vmem:[#allocation7 + $0x6d0] sm:$0xff] }
  0xb1   :  { %2248 = vmatprep.subr.bf16.mxu0 %v2247_v60  ;;  %v305_v60 = vld [vmem:[#allocation7 + $0x4f0] sm:$0xff]  ;;  %v2311_v50 = vpack.c.bf16 %v360_v44, %v359_v43  ;;  %v343_v51 = vld [vmem:[#allocation7 + $0x620] sm:$0xff]  ;;  %v352_v44 = vld [vmem:[#allocation7 + $0x668] sm:$0xff] }
  0xb2   :  { %2278 = vmatpush3.bf16.msra.mxu1 %v2277_v59  ;;  %v320_v59 = vld [vmem:[#allocation7 + $0x568] sm:$0xff]  ;;  %v2267_v2 = vpack.c.bf16 %v306_v61, %v305_v60  ;;  %v351_v43 = vld [vmem:[#allocation7 + $0x660] sm:$0xff] }
  0xb3   :  { %2280 = vmatprep.subr.bf16.mxu1 %v2279_v0  ;;  %v2265_v0 = vpack.c.bf16 %v288_v56, %v287_v55  ;;  %v2297_v1 = vpack.c.bf16 %v320_v59, %v319_v57  ;;  %v376_v55 = vld [vmem:[#allocation7 + $0x728] sm:$0xff]  ;;  %v362_v56 = vld [vmem:[#allocation7 + $0x6b8] sm:$0xff]  ;;  %v393_v57 = vld [vmem:[#allocation7 + $0x7b0] sm:$0xff] }
  0xb4   :  { %2250 = vmatpush3.bf16.msra.mxu0 %v2249_v6  ;;  %v2299_v6 = vpack.c.bf16 %v338_v63, %v337_v62  ;;  %v2315_v61 = vpack.c.bf16 %v362_v56, %v361_v32  ;;  %v345_v62 = vld [vmem:[#allocation7 + $0x630] sm:$0xff]  ;;  %v346_v63 = vld [vmem:[#allocation7 + $0x638] sm:$0xff] }
  0xb5   :  { %2252 = vmatprep.subr.bf16.mxu0 %v2251_v8  ;;  %v355_v8 = vld [vmem:[#allocation7 + $0x680] sm:$0xff]  ;;  %v385_v32 = vld [vmem:[#allocation7 + $0x770] sm:$0xff] }
  0xb6   :  { %2282 = vmatpush3.bf16.msra.mxu1 %v2281_v7  ;;  %v322_v7 = vld [vmem:[#allocation7 + $0x578] sm:$0xff]  ;;  %v2303_v15 = vpack.c.bf16 %v356_v9, %v355_v8 }
  0xb7   :  { %2284 = vmatprep.subr.bf16.mxu1 %v2283_v13  ;;  %v2269_v13 = vpack.c.bf16 %v290_v4, %v289_v3  ;;  %v2301_v14 = vpack.c.bf16 %v322_v7, %v321_v5  ;;  %v363_v3 = vld [vmem:[#allocation7 + $0x6c0] sm:$0xff]  ;;  %v364_v4 = vld [vmem:[#allocation7 + $0x6c8] sm:$0xff]  ;;  %v2317_v7 = vpack.c.bf16 %v346_v63, %v345_v62 }
  0xb8   :  { %2254 = vmatpush3.bf16.msra.mxu0 %v2253_v20  ;;  %v2335_v20 = vpack.c.bf16 %v388_v12, %v387_v11  ;;  %v395_v5 = vld [vmem:[#allocation7 + $0x7c0] sm:$0xff]  ;;  %v2319_v9 = vpack.c.bf16 %v364_v4, %v363_v3  ;;  %v348_v12 = vld [vmem:[#allocation7 + $0x648] sm:$0xff] }
  0xb9   :  { %2256 = vmatprep.subr.bf16.mxu0 %v2255_v22  ;;  %v357_v22 = vld [vmem:[#allocation7 + $0x690] sm:$0xff]  ;;  %v347_v11 = vld [vmem:[#allocation7 + $0x640] sm:$0xff] }
  0xba   :  { %2286 = vmatpush3.bf16.msra.mxu1 %v2285_v21  ;;  %v372_v21 = vld [vmem:[#allocation7 + $0x708] sm:$0xff]  ;;  %v2307_v34 = vpack.c.bf16 %v358_v25, %v357_v22  ;;  %v2323_v25 = vpack.c.bf16 %v366_v17, %v365_v16  ;;  %v435_v3 = vld [vmem:[#allocation7 + $0x900] sm:$0xff]  ;;  %v405_v17 = vld [vmem:[#allocation7 + $0x810] sm:$0xff] }
  0xbb   :  { %2288 = vmatprep.subr.bf16.mxu1 %v2287_v28  ;;  %v390_v28 = vld [vmem:[#allocation7 + $0x798] sm:$0xff]  ;;  %v2337_v33 = vpack.c.bf16 %v372_v21, %v371_v19  ;;  %v397_v19 = vld [vmem:[#allocation7 + $0x7d0] sm:$0xff]  ;;  %v2321_v21 = vpack.c.bf16 %v348_v12, %v347_v11  ;;  %v2902_v12 = vstv %s2897_s18 }
  0xbc   :  { %2258 = vmatpush3.bf16.msra.mxu0 %v2257_v36  ;;  %v342_v36 = vld [vmem:[#allocation7 + $0x618] sm:$0xff] }
  0xbd   :  { %2260 = vmatprep.subr.bf16.mxu0 %v2259_v39  ;;  %v2339_v39 = vpack.c.bf16 %v390_v28, %v389_v27  ;;  %v2309_v48 = vpack.c.bf16 %v342_v36, %v341_v35  ;;  %v350_v27 = vld [vmem:[#allocation7 + $0x658] sm:$0xff]  ;;  %v381_v28 = vld [vmem:[#allocation7 + $0x750] sm:$0xff]  ;;  %v399_v35 = vld [vmem:[#allocation7 + $0x7e0] sm:$0xff] }
  0xbe   :  { %2290 = vmatpush3.bf16.msra.mxu1 %v2289_v37  ;;  %v373_v37 = vld [vmem:[#allocation7 + $0x710] sm:$0xff]  ;;  %v400_v36 = vld [vmem:[#allocation7 + $0x7e8] sm:$0xff]  ;;  %v454_v11 = vld [vmem:[#allocation7 + $0x998] sm:$0xff] }
  0xbf   :  { %2292 = vmatprep.subr.bf16.mxu1 %v2291_v46  ;;  %v391_v46 = vld [vmem:[#allocation7 + $0x7a0] sm:$0xff]  ;;  %v2341_v49 = vpack.c.bf16 %v374_v42, %v373_v37 }
  0xc0   :  { %2262 = vmatpush3.bf16.msra.mxu0 %v2261_v52  ;;  %v344_v52 = vld [vmem:[#allocation7 + $0x628] sm:$0xff] }
  0xc1   :  { %2264 = vmatprep.subr.bf16.mxu0 %v2263_v54  ;;  %v2343_v54 = vpack.c.bf16 %v392_v47, %v391_v46  ;;  %v2313_v59 = vpack.c.bf16 %v344_v52, %v343_v51  ;;  %v2359_v46 = vpack.c.bf16 %v400_v36, %v399_v35  ;;  %v384_v47 = vld [vmem:[#allocation7 + $0x768] sm:$0xff]  ;;  %v2329_v51 = vpack.c.bf16 %v352_v44, %v351_v43  ;;  %v439_v36 = vld [vmem:[#allocation7 + $0x920] sm:$0xff]  ;;  %v457_v43 = vld [vmem:[#allocation7 + $0x9b0] sm:$0xff] }
  0xc2   :  { %2294 = vmatpush3.bf16.msra.mxu1 %v2293_v53  ;;  %v375_v53 = vld [vmem:[#allocation7 + $0x720] sm:$0xff]  ;;  %v408_v35 = vld [vmem:[#allocation7 + $0x828] sm:$0xff]  ;;  %v458_v44 = vld [vmem:[#allocation7 + $0x9b8] sm:$0xff] }
  0xc3   :  { %2296 = vmatprep.subr.bf16.mxu1 %v2295_v58  ;;  %v394_v58 = vld [vmem:[#allocation7 + $0x7b8] sm:$0xff]  ;;  %v2345_v60 = vpack.c.bf16 %v376_v55, %v375_v53 }
  0xc4   :  { %2266 = vmatpush3.bf16.msra.mxu0 %v2265_v0  ;;  %v377_v0 = vld [vmem:[#allocation7 + $0x730] sm:$0xff]  ;;  %v354_v55 = vld [vmem:[#allocation7 + $0x678] sm:$0xff] }
  0xc5   :  { %2268 = vmatprep.subr.bf16.mxu0 %v2267_v2  ;;  %v378_v2 = vld [vmem:[#allocation7 + $0x738] sm:$0xff] }
  0xc6   :  { %2298 = vmatpush3.bf16.msra.mxu1 %v2297_v1  ;;  %v2347_v1 = vpack.c.bf16 %v394_v58, %v393_v57  ;;  %v2349_v8 = vpack.c.bf16 %v378_v2, %v377_v0  ;;  %v386_v57 = vld [vmem:[#allocation7 + $0x778] sm:$0xff]  ;;  %v419_v58 = vld [vmem:[#allocation7 + $0x880] sm:$0xff]  ;;  %v404_v2 = vld [vmem:[#allocation7 + $0x808] sm:$0xff] }
  0xc7   :  { %2300 = vmatprep.subr.bf16.mxu1 %v2299_v6  ;;  %v396_v6 = vld [vmem:[#allocation7 + $0x7c8] sm:$0xff]  ;;  %v2365_v63 = vpack.c.bf16 %v386_v57, %v385_v32  ;;  %v411_v57 = vld [vmem:[#allocation7 + $0x840] sm:$0xff] }
  0xc8   :  { %2270 = vmatpush3.bf16.msra.mxu0 %v2269_v13  ;;  %v379_v13 = vld [vmem:[#allocation7 + $0x740] sm:$0xff] }
  0xc9   :  { %2304 = vmatprep.subr.bf16.mxu0 %v2303_v15  ;;  %v380_v15 = vld [vmem:[#allocation7 + $0x748] sm:$0xff] }
  0xca   :  { %2302 = vmatpush3.bf16.msra.mxu1 %v2301_v14  ;;  %v2351_v14 = vpack.c.bf16 %v396_v6, %v395_v5  ;;  %v2353_v22 = vpack.c.bf16 %v380_v15, %v379_v13  ;;  %v436_v5 = vld [vmem:[#allocation7 + $0x908] sm:$0xff]  ;;  %v421_v6 = vld [vmem:[#allocation7 + $0x890] sm:$0xff] }
  0xcb   :  { %2336 = vmatprep.subr.bf16.mxu1 %v2335_v20  ;;  %882 = vmatmul.mubr.f32.vlgmr.msra.gmra.mrb[4].mxu0 %v122_v26  ;;  %v398_v20 = vld [vmem:[#allocation7 + $0x7d8] sm:$0xff]  ;;  %v349_v26 = vld [vmem:[#allocation7 + $0x650] sm:$0xff]  ;;  %v2401_v15 = vpack.c.bf16 %v436_v5, %v435_v3 }
  0xcc   :  { %2306 = vmatpush3.bf16.msra.mxu0 %v2305_v30  ;;  %1021 = vmatprep.mubr.f32.mxu0 %v127_v40  ;;  %v2355_v30 = vpack.c.bf16 %v398_v20, %v397_v19  ;;  %v2325_v37 = vpack.c.bf16 %v350_v27, %v349_v26  ;;  %v383_v40 = vld [vmem:[#allocation7 + $0x760] sm:$0xff]  ;;  %v406_v19 = vld [vmem:[#allocation7 + $0x818] sm:$0xff]  ;;  %v437_v20 = vld [vmem:[#allocation7 + $0x910] sm:$0xff]  ;;  %v132_v26 = vmul.f32 %v2902_v12, %v2848_v18 }
  0xcd   :  { %952 = vmatmul.mubr.f32.vlgmr.msra.gmra.mrb[4].mxu1 %v124_v31  ;;  %2308 = vmatprep.subr.bf16.mxu0 %v2307_v34  ;;  %v382_v31 = vld [vmem:[#allocation7 + $0x758] sm:$0xff]  ;;  %v368_v34 = vld [vmem:[#allocation7 + $0x6e8] sm:$0xff]  ;;  %v2361_v52 = vpack.c.bf16 %v384_v47, %v383_v40  ;;  %v455_v27 = vld [vmem:[#allocation7 + $0x9a0] sm:$0xff] }
  0xce   :  { %2338 = vmatpush3.bf16.msra.mxu1 %v2337_v33  ;;  %1091 = vmatprep.mubr.f32.mxu1 %v129_v45  ;;  %v367_v33 = vld [vmem:[#allocation7 + $0x6e0] sm:$0xff]  ;;  %v369_v45 = vld [vmem:[#allocation7 + $0x6f0] sm:$0xff] }
  0xcf   :  { %2340 = vmatprep.subr.bf16.mxu1 %v2339_v39  ;;  %v2357_v39 = vpack.c.bf16 %v382_v31, %v381_v28  ;;  %v2327_v42 = vpack.c.bf16 %v368_v34, %v367_v33  ;;  %v456_v28 = vld [vmem:[#allocation7 + $0x9a8] sm:$0xff]  ;;  %v407_v34 = vld [vmem:[#allocation7 + $0x820] sm:$0xff]  ;;  %v425_v18 = vld [vmem:[#allocation7 + $0x8b0] sm:$0xff] }
  0xd0   :  { %2310 = vmatpush3.bf16.msra.mxu0 %v2309_v48  ;;  %v370_v48 = vld [vmem:[#allocation7 + $0x6f8] sm:$0xff]  ;;  %v409_v47 = vld [vmem:[#allocation7 + $0x830] sm:$0xff] }
  0xd1   :  { %2312 = vmatprep.subr.bf16.mxu0 %v2311_v50  ;;  %v402_v50 = vld [vmem:[#allocation7 + $0x7f8] sm:$0xff]  ;;  %v2331_v53 = vpack.c.bf16 %v370_v48, %v369_v45  ;;  %v441_v48 = vld [vmem:[#allocation7 + $0x930] sm:$0xff] }
  0xd2   :  { %2342 = vmatpush3.bf16.msra.mxu1 %v2341_v49  ;;  %v401_v49 = vld [vmem:[#allocation7 + $0x7f0] sm:$0xff]  ;;  %v410_v45 = vld [vmem:[#allocation7 + $0x838] sm:$0xff] }
  0xd3   :  { %2344 = vmatprep.subr.bf16.mxu1 %v2343_v54  ;;  %v353_v54 = vld [vmem:[#allocation7 + $0x670] sm:$0xff]  ;;  %v2363_v56 = vpack.c.bf16 %v402_v50, %v401_v49  ;;  %v2411_v49 = vpack.c.bf16 %v458_v44, %v457_v43  ;;  %v442_v50 = vld [vmem:[#allocation7 + $0x938] sm:$0xff]  ;;  %v515_v43 = vld [vmem:[#allocation7 + $0xb80] sm:$0xff] }
  0xd4   :  { %2314 = vmatpush3.bf16.msra.mxu0 %v2313_v59  ;;  %v420_v59 = vld [vmem:[#allocation7 + $0x888] sm:$0xff]  ;;  %v2333_v62 = vpack.c.bf16 %v354_v55, %v353_v54  ;;  %v2381_v55 = vpack.c.bf16 %v410_v45, %v409_v47  ;;  %v2413_v32 = vpack.c.bf16 %v442_v50, %v441_v48  ;;  %v413_v5 = vld [vmem:[#allocation7 + $0x850] sm:$0xff]  ;;  %v467_v47 = vld [vmem:[#allocation7 + $0xa00] sm:$0xff] }
  0xd5   :  { %2316 = vmatprep.subr.bf16.mxu0 %v2315_v61  ;;  %v452_v61 = vld [vmem:[#allocation7 + $0x988] sm:$0xff]  ;;  %v2367_v0 = vpack.c.bf16 %v420_v59, %v419_v58  ;;  %v443_v59 = vld [vmem:[#allocation7 + $0x940] sm:$0xff] }
  0xd6   :  { %2346 = vmatpush3.bf16.msra.mxu1 %v2345_v60  ;;  %v451_v60 = vld [vmem:[#allocation7 + $0x980] sm:$0xff]  ;;  %v460_v54 = vld [vmem:[#allocation7 + $0x9c8] sm:$0xff] }
  0xd7   :  { %2348 = vmatprep.subr.bf16.mxu1 %v2347_v1  ;;  %v403_v1 = vld [vmem:[#allocation7 + $0x800] sm:$0xff]  ;;  %v2399_v4 = vpack.c.bf16 %v452_v61, %v451_v60  ;;  %v412_v58 = vld [vmem:[#allocation7 + $0x848] sm:$0xff] }
  0xd8   :  { %2318 = vmatpush3.bf16.msra.mxu0 %v2317_v7  ;;  %v422_v7 = vld [vmem:[#allocation7 + $0x898] sm:$0xff]  ;;  %v2369_v13 = vpack.c.bf16 %v404_v2, %v403_v1  ;;  %v444_v61 = vld [vmem:[#allocation7 + $0x948] sm:$0xff]  ;;  %v2385_v2 = vpack.c.bf16 %v412_v58, %v411_v57  ;;  %v499_v48 = vld [vmem:[#allocation7 + $0xb00] sm:$0xff] }
  0xd9   :  { %2320 = vmatprep.subr.bf16.mxu0 %v2319_v9  ;;  %v453_v9 = vld [vmem:[#allocation7 + $0x990] sm:$0xff]  ;;  %v2371_v16 = vpack.c.bf16 %v422_v7, %v421_v6  ;;  %v462_v1 = vld [vmem:[#allocation7 + $0x9d8] sm:$0xff]  ;;  %v2417_v3 = vpack.c.bf16 %v444_v61, %v443_v59  ;;  %v516_v44 = vld [vmem:[#allocation7 + $0xb88] sm:$0xff] }
  0xda   :  { %2350 = vmatpush3.bf16.msra.mxu1 %v2349_v8  ;;  %v126_v8 = vmul.f32 %v2881_v41, %v2874_v24  ;;  %v423_v24 = vld [vmem:[#allocation7 + $0x8a0] sm:$0xff]  ;;  %v414_v6 = vld [vmem:[#allocation7 + $0x858] sm:$0xff]  ;;  %v445_v7 = vld [vmem:[#allocation7 + $0x950] sm:$0xff] }
  0xdb   :  { %2352 = vmatprep.subr.bf16.mxu1 %v2351_v14  ;;  %v128_v14 = vmul.f32 %v2881_v41, %v2876_v29  ;;  %v134_v29 = vmul.f32 %v2902_v12, %v2852_v23  ;;  %v2377_v23 = vpack.c.bf16 %v408_v35, %v407_v34  ;;  %v417_v34 = vld [vmem:[#allocation7 + $0x870] sm:$0xff]  ;;  %v418_v35 = vld [vmem:[#allocation7 + $0x878] sm:$0xff]  ;;  %v468_v45 = vld [vmem:[#allocation7 + $0xa08] sm:$0xff] }
  0xdc   :  { %2322 = vmatpush3.bf16.msra.mxu0 %v2321_v21  ;;  %v2403_v21 = vpack.c.bf16 %v454_v11, %v453_v9  ;;  %v446_v9 = vld [vmem:[#allocation7 + $0x958] sm:$0xff]  ;;  %v431_v11 = vld [vmem:[#allocation7 + $0x8e0] sm:$0xff]  ;;  %v500_v50 = vld [vmem:[#allocation7 + $0xb08] sm:$0xff] }
  0xdd   :  { %2324 = vmatprep.subr.bf16.mxu0 %v2323_v25  ;;  %v424_v25 = vld [vmem:[#allocation7 + $0x8a8] sm:$0xff]  ;;  %v2566_v57 = vld [vmem:[#allocation6 + $0x10] sm:$0xff]  ;;  %v2465_v59 = vpack.c.bf16 %v500_v50, %v499_v48  ;;  %v526_v48 = vld [vmem:[#allocation7 + $0xbd8] sm:$0xff] }
  0xde   :  { %2354 = vmatpush3.bf16.msra.mxu1 %v2353_v22  ;;  %v438_v22 = vld [vmem:[#allocation7 + $0x918] sm:$0xff]  ;;  %v2375_v33 = vpack.c.bf16 %v424_v25, %v423_v24  ;;  %v448_v25 = vld [vmem:[#allocation7 + $0x968] sm:$0xff]  ;;  %v133_v58 = vmul.f32 %v2566_v57, %v2902_v12  ;;  %v469_v61 = vld [vmem:[#allocation7 + $0xa10] sm:$0xff] }
  0xdf   :  { %2356 = vmatprep.subr.bf16.mxu1 %v2355_v30  ;;  %v2373_v30 = vpack.c.bf16 %v406_v19, %v405_v17  ;;  %v2405_v31 = vpack.c.bf16 %v438_v22, %v437_v20  ;;  %v2421_v17 = vpack.c.bf16 %v446_v9, %v445_v7  ;;  %v415_v20 = vld [vmem:[#allocation7 + $0x860] sm:$0xff]  ;;  %v520_v7 = vld [vmem:[#allocation7 + $0xba8] sm:$0xff] }
  0xe0   :  { %2326 = vmatpush3.bf16.msra.mxu0 %v2325_v37  ;;  %v2407_v37 = vpack.c.bf16 %v456_v28, %v455_v27  ;;  %v447_v22 = vld [vmem:[#allocation7 + $0x960] sm:$0xff]  ;;  %v434_v27 = vld [vmem:[#allocation7 + $0x8f8] sm:$0xff]  ;;  %v465_v28 = vld [vmem:[#allocation7 + $0x9f0] sm:$0xff] }
  0xe1   :  { %2328 = vmatprep.subr.bf16.mxu0 %v2327_v42  ;;  %v426_v42 = vld [vmem:[#allocation7 + $0x8b8] sm:$0xff]  ;;  %v496_v57 = vld [vmem:[#allocation7 + $0xae8] sm:$0xff] }
  0xe2   :  { %2358 = vmatpush3.bf16.msra.mxu1 %v2357_v39  ;;  %v440_v39 = vld [vmem:[#allocation7 + $0x928] sm:$0xff] }
  0xe3   :  { %2360 = vmatprep.subr.bf16.mxu1 %v2359_v46  ;;  %v2409_v40 = vpack.c.bf16 %v440_v39, %v439_v36  ;;  %v2379_v46 = vpack.c.bf16 %v426_v42, %v425_v18  ;;  %v449_v36 = vld [vmem:[#allocation7 + $0x970] sm:$0xff]  ;;  %v450_v39 = vld [vmem:[#allocation7 + $0x978] sm:$0xff]  ;;  %v483_v18 = vld [vmem:[#allocation7 + $0xa80] sm:$0xff] }
  0xe4   :  { %2330 = vmatpush3.bf16.msra.mxu0 %v2329_v51  ;;  %v427_v51 = vld [vmem:[#allocation7 + $0x8c0] sm:$0xff]  ;;  %v484_v42 = vld [vmem:[#allocation7 + $0xa88] sm:$0xff] }
  0xe5   :  { %2332 = vmatprep.subr.bf16.mxu0 %v2331_v53  ;;  %v459_v53 = vld [vmem:[#allocation7 + $0x9c0] sm:$0xff] }
  0xe6   :  { %2362 = vmatpush3.bf16.msra.mxu1 %v2361_v52  ;;  %v428_v52 = vld [vmem:[#allocation7 + $0x8c8] sm:$0xff]  ;;  %v2415_v60 = vpack.c.bf16 %v460_v54, %v459_v53  ;;  %v2565_v53 = vld [vmem:[#allocation6] sm:$0xff] }
  0xe7   :  { %2364 = vmatprep.subr.bf16.mxu1 %v2363_v56  ;;  %v2383_v56 = vpack.c.bf16 %v428_v52, %v427_v51  ;;  %v485_v51 = vld [vmem:[#allocation7 + $0xa90] sm:$0xff]  ;;  %v486_v52 = vld [vmem:[#allocation7 + $0xa98] sm:$0xff]  ;;  %v131_v54 = vmul.f32 %v2565_v53, %v2902_v12 }
  0xe8   :  { %2334 = vmatpush3.bf16.msra.mxu0 %v2333_v62  ;;  %v429_v62 = vld [vmem:[#allocation7 + $0x8d0] sm:$0xff]  ;;  %v478_v53 = vld [vmem:[#allocation7 + $0xa58] sm:$0xff] }
  0xe9   :  { %2368 = vmatprep.subr.bf16.mxu0 %v2367_v0  ;;  %v461_v0 = vld [vmem:[#allocation7 + $0x9d0] sm:$0xff] }
  0xea   :  { %2366 = vmatpush3.bf16.msra.mxu1 %v2365_v63  ;;  %v430_v63 = vld [vmem:[#allocation7 + $0x8d8] sm:$0xff] }
  0xeb   :  { %2400 = vmatprep.subr.bf16.mxu1 %v2399_v4  ;;  %1022 = vmatmul.mubr.f32.vlgmr.msra.gmra.mrb[6].mxu0 %v126_v8  ;;  %v2387_v4 = vpack.c.bf16 %v430_v63, %v429_v62  ;;  %v2419_v8 = vpack.c.bf16 %v462_v1, %v461_v0  ;;  %v470_v62 = vld [vmem:[#allocation7 + $0xa18] sm:$0xff]  ;;  %v501_v63 = vld [vmem:[#allocation7 + $0xb10] sm:$0xff] }
  0xec   :  { %2370 = vmatpush3.bf16.msra.mxu0 %v2369_v13  ;;  %1161 = vmatprep.mubr.f32.mxu0 %v132_v26  ;;  %v432_v13 = vld [vmem:[#allocation7 + $0x8e8] sm:$0xff]  ;;  %v433_v26 = vld [vmem:[#allocation7 + $0x8f0] sm:$0xff]  ;;  %v502_v1 = vld [vmem:[#allocation7 + $0xb18] sm:$0xff]  ;;  %v2437_v9 = vpack.c.bf16 %v470_v62, %v469_v61 }
  0xed   :  { %1092 = vmatmul.mubr.f32.vlgmr.msra.gmra.mrb[6].mxu1 %v128_v14  ;;  %2372 = vmatprep.subr.bf16.mxu0 %v2371_v16  ;;  %v463_v14 = vld [vmem:[#allocation7 + $0x9e0] sm:$0xff]  ;;  %v2389_v16 = vpack.c.bf16 %v414_v6, %v413_v5  ;;  %v2391_v19 = vpack.c.bf16 %v432_v13, %v431_v11  ;;  %v2469_v11 = vpack.c.bf16 %v502_v1, %v501_v63 }
  0xee   :  { %2402 = vmatpush3.bf16.msra.mxu1 %v2401_v15  ;;  %1231 = vmatprep.mubr.f32.mxu1 %v134_v29  ;;  %v464_v15 = vld [vmem:[#allocation7 + $0x9e8] sm:$0xff]  ;;  %v466_v29 = vld [vmem:[#allocation7 + $0x9f8] sm:$0xff]  ;;  %v519_v6 = vld [vmem:[#allocation7 + $0xba0] sm:$0xff] }
  0xef   :  { %2404 = vmatprep.subr.bf16.mxu1 %v2403_v21  ;;  %v416_v21 = vld [vmem:[#allocation7 + $0x868] sm:$0xff]  ;;  %v2423_v24 = vpack.c.bf16 %v464_v15, %v463_v14  ;;  %v471_v14 = vld [vmem:[#allocation7 + $0xa20] sm:$0xff] }
  0xf0   :  { %2374 = vmatpush3.bf16.msra.mxu0 %v2373_v30  ;;  %v2393_v30 = vpack.c.bf16 %v416_v21, %v415_v20  ;;  %v472_v15 = vld [vmem:[#allocation7 + $0xa28] sm:$0xff]  ;;  %v489_v20 = vld [vmem:[#allocation7 + $0xab0] sm:$0xff]  ;;  %v490_v21 = vld [vmem:[#allocation7 + $0xab8] sm:$0xff] }
  0xf1   :  { %2376 = vmatprep.subr.bf16.mxu0 %v2375_v33  ;;  %v2395_v33 = vpack.c.bf16 %v434_v27, %v433_v26  ;;  %v2443_v26 = vpack.c.bf16 %v490_v21, %v489_v20  ;;  %v473_v27 = vld [vmem:[#allocation7 + $0xa30] sm:$0xff]  ;;  %v479_v63 = vld [vmem:[#allocation7 + $0xa60] sm:$0xff] }
  0xf2   :  { %2406 = vmatpush3.bf16.msra.mxu1 %v2405_v31  ;;  %v2425_v31 = vpack.c.bf16 %v448_v25, %v447_v22  ;;  %v521_v22 = vld [vmem:[#allocation7 + $0xbb0] sm:$0xff]  ;;  %v511_v1 = vld [vmem:[#allocation7 + $0xb60] sm:$0xff] }
  0xf3   :  { %2408 = vmatprep.subr.bf16.mxu1 %v2407_v37  ;;  %v2427_v37 = vpack.c.bf16 %v466_v29, %v465_v28  ;;  %v474_v28 = vld [vmem:[#allocation7 + $0xa38] sm:$0xff]  ;;  %v505_v29 = vld [vmem:[#allocation7 + $0xb30] sm:$0xff]  ;;  %v2568_v21 = vld [vmem:[#allocation6 + $0x20] sm:$0xff] }
  0xf4   :  { %2378 = vmatpush3.bf16.msra.mxu0 %v2377_v23  ;;  %v2397_v23 = vpack.c.bf16 %v418_v35, %v417_v34  ;;  %v492_v34 = vld [vmem:[#allocation7 + $0xac8] sm:$0xff]  ;;  %v523_v35 = vld [vmem:[#allocation7 + $0xbc0] sm:$0xff] }
  0xf5   :  { %2380 = vmatprep.subr.bf16.mxu0 %v2379_v46  ;;  %v2431_v46 = vpack.c.bf16 %v484_v42, %v483_v18  ;;  %v475_v42 = vld [vmem:[#allocation7 + $0xa40] sm:$0xff] }
  0xf6   :  { %2410 = vmatpush3.bf16.msra.mxu1 %v2409_v40  ;;  %v2429_v40 = vpack.c.bf16 %v450_v39, %v449_v36  ;;  %v524_v36 = vld [vmem:[#allocation7 + $0xbc8] sm:$0xff] }
  0xf7   :  { %2412 = vmatprep.subr.bf16.mxu1 %v2411_v49  ;;  %v2463_v49 = vpack.c.bf16 %v516_v44, %v515_v43  ;;  %v476_v43 = vld [vmem:[#allocation7 + $0xa48] sm:$0xff]  ;;  %v507_v44 = vld [vmem:[#allocation7 + $0xb40] sm:$0xff] }
  0xf8   :  { %2382 = vmatpush3.bf16.msra.mxu0 %v2381_v55  ;;  %v517_v55 = vld [vmem:[#allocation7 + $0xb90] sm:$0xff] }
  0xf9   :  { %2384 = vmatprep.subr.bf16.mxu0 %v2383_v56  ;;  %v2433_v56 = vpack.c.bf16 %v468_v45, %v467_v47  ;;  %v494_v47 = vld [vmem:[#allocation7 + $0xad8] sm:$0xff]  ;;  %v525_v45 = vld [vmem:[#allocation7 + $0xbd0] sm:$0xff] }
  0xfa   :  { %2414 = vmatpush3.bf16.msra.mxu1 %v2413_v32  ;;  %v518_v32 = vld [vmem:[#allocation7 + $0xb98] sm:$0xff] }
  0xfb   :  { %2416 = vmatprep.subr.bf16.mxu1 %v2415_v60  ;;  %v2435_v60 = vpack.c.bf16 %v486_v52, %v485_v51  ;;  %v2467_v0 = vpack.c.bf16 %v518_v32, %v517_v55  ;;  %v477_v52 = vld [vmem:[#allocation7 + $0xa50] sm:$0xff]  ;;  %v2483_v55 = vpack.c.bf16 %v526_v48, %v525_v45  ;;  %v510_v32 = vld [vmem:[#allocation7 + $0xb58] sm:$0xff]  ;;  %v1421_v48 = vld [vmem:[#allocation10 + $0x100] sm:$0xff] }
  0xfc   :  { %2386 = vmatpush3.bf16.msra.mxu0 %v2385_v2  ;;  %v487_v2 = vld [vmem:[#allocation7 + $0xaa0] sm:$0xff]  ;;  %v1406_v45 = vld [vmem:[#allocation10 + $0x88] sm:$0xff] }
  0xfd   :  { %2388 = vmatprep.subr.bf16.mxu0 %v2387_v4  ;;  %v2567_v4 = vld [vmem:[#allocation6 + $0x28] sm:$0xff] }
  0xfe   :  { %2418 = vmatpush3.bf16.msra.mxu1 %v2417_v3  ;;  %v488_v3 = vld [vmem:[#allocation7 + $0xaa8] sm:$0xff]  ;;  %v136_v5 = vmul.f32 %v2567_v4, %v2902_v12  ;;  %v497_v4 = vld [vmem:[#allocation7 + $0xaf0] sm:$0xff] }
  0xff   :  { %2420 = vmatprep.subr.bf16.mxu1 %v2419_v8  ;;  %v138_v8 = vmul.f32 %v2902_v12, %v2868_v38  ;;  %v2439_v13 = vpack.c.bf16 %v488_v3, %v487_v2  ;;  %v2441_v38 = vpack.c.bf16 %v472_v15, %v471_v14  ;;  %v512_v3 = vld [vmem:[#allocation7 + $0xb68] sm:$0xff]  ;;  %v482_v14 = vld [vmem:[#allocation7 + $0xa78] sm:$0xff] }
 0x100   :  { %2390 = vmatpush3.bf16.msra.mxu0 %v2389_v16  ;;  %v503_v16 = vld [vmem:[#allocation7 + $0xb20] sm:$0xff] }
 0x101   :  { %2392 = vmatprep.subr.bf16.mxu0 %v2391_v19  ;;  %v504_v19 = vld [vmem:[#allocation7 + $0xb28] sm:$0xff] }
 0x102   :  { %2422 = vmatpush3.bf16.msra.mxu1 %v2421_v17  ;;  %v2471_v17 = vpack.c.bf16 %v520_v7, %v519_v6  ;;  %v2473_v25 = vpack.c.bf16 %v504_v19, %v503_v16  ;;  %v529_v6 = vld [vmem:[#allocation7 + $0xbf0] sm:$0xff]  ;;  %v530_v7 = vld [vmem:[#allocation7 + $0xbf8] sm:$0xff] }
 0x103   :  { %2424 = vmatprep.subr.bf16.mxu1 %v2423_v24  ;;  %v522_v24 = vld [vmem:[#allocation7 + $0xbb8] sm:$0xff]  ;;  %v2491_v15 = vpack.c.bf16 %v530_v7, %v529_v6  ;;  %v513_v16 = vld [vmem:[#allocation7 + $0xb70] sm:$0xff] }
 0x104   :  { %2394 = vmatpush3.bf16.msra.mxu0 %v2393_v30  ;;  %v2475_v30 = vpack.c.bf16 %v522_v24, %v521_v22  ;;  %v135_v22 = vmul.f32 %v2568_v21, %v2902_v12  ;;  %v2569_v24 = vld [vmem:[#allocation6 + $0x30] sm:$0xff] }
 0x105   :  { %2396 = vmatprep.subr.bf16.mxu0 %v2395_v33  ;;  %v491_v33 = vld [vmem:[#allocation7 + $0xac0] sm:$0xff]  ;;  %v1394_v6 = vld [vmem:[#allocation10 + $0x28] sm:$0xff]  ;;  %v1411_v7 = vld [vmem:[#allocation10 + $0xb0] sm:$0xff] }
 0x106   :  { %2426 = vmatpush3.bf16.msra.mxu1 %v2425_v31  ;;  %v506_v31 = vld [vmem:[#allocation7 + $0xb38] sm:$0xff]  ;;  %v2447_v18 = vpack.c.bf16 %v492_v34, %v491_v33 }
 0x107   :  { %2428 = vmatprep.subr.bf16.mxu1 %v2427_v37  ;;  %v2445_v37 = vpack.c.bf16 %v474_v28, %v473_v27  ;;  %v2477_v39 = vpack.c.bf16 %v506_v31, %v505_v29  ;;  %v532_v29 = vlaneseq }
 0x108   :  { %2398 = vmatpush3.bf16.msra.mxu0 %v2397_v23  ;;  %v2479_v23 = vpack.c.bf16 %v524_v36, %v523_v35 }
 0x109   :  { %2432 = vmatprep.subr.bf16.mxu0 %v2431_v46  ;;  %v493_v46 = vld [vmem:[#allocation7 + $0xad0] sm:$0xff]  ;;  %v2920_v34 = vshrl.u32 %v532_v29, 7 }
 0x10a   :  { %2430 = vmatpush3.bf16.msra.mxu1 %v2429_v40  ;;  %v508_v40 = vld [vmem:[#allocation7 + $0xb48] sm:$0xff]  ;;  %v2451_v51 = vpack.c.bf16 %v494_v47, %v493_v46 }
 0x10b   :  { %2464 = vmatprep.subr.bf16.mxu1 %v2463_v49  ;;  %1162 = vmatmul.mubr.f32.vlgmr.msra.gmra.mrb[8].mxu0 %v131_v54  ;;  %v2449_v49 = vpack.c.bf16 %v476_v43, %v475_v42  ;;  %v2481_v50 = vpack.c.bf16 %v508_v40, %v507_v44  ;;  %v509_v54 = vld [vmem:[#allocation7 + $0xb50] sm:$0xff]  ;;  %v534_v36 = vsub.s32 0, %v2920_v34  ;;  %v1405_v47 = vld [vmem:[#allocation10 + $0x80] sm:$0xff] }
 0x10c   :  { %2434 = vmatpush3.bf16.msra.mxu0 %v2433_v56  ;;  %1301 = vmatprep.mubr.f32.mxu0 %v136_v5  ;;  %v495_v56 = vld [vmem:[#allocation7 + $0xae0] sm:$0xff]  ;;  %v2485_v61 = vpack.c.bf16 %v510_v32, %v509_v54  ;;  %v498_v5 = vld [vmem:[#allocation7 + $0xaf8] sm:$0xff] }
 0x10d   :  { %1232 = vmatmul.mubr.f32.vlgmr.msra.gmra.mrb[8].mxu1 %v133_v58  ;;  %2436 = vmatprep.subr.bf16.mxu0 %v2435_v60  ;;  %v527_v58 = vld [vmem:[#allocation7 + $0xbe0] sm:$0xff]  ;;  %v2453_v60 = vpack.c.bf16 %v478_v53, %v477_v52  ;;  %v2455_v62 = vpack.c.bf16 %v496_v57, %v495_v56  ;;  %v1390_v53 = vld [vmem:[#allocation10 + $0x8] sm:$0xff]  ;;  %v1407_v32 = vld [vmem:[#allocation10 + $0x90] sm:$0xff] }
 0x10e   :  { %2466 = vmatpush3.bf16.msra.mxu1 %v2465_v59  ;;  %1371 = vmatprep.mubr.f32.mxu1 %v138_v8  ;;  %v528_v59 = vld [vmem:[#allocation7 + $0xbe8] sm:$0xff]  ;;  %v1408_v56 = vld [vmem:[#allocation10 + $0x98] sm:$0xff]  ;;  %v1423_v57 = vld [vmem:[#allocation10 + $0x110] sm:$0xff] }
 0x10f   :  { %2468 = vmatprep.subr.bf16.mxu1 %v2467_v0  ;;  %v480_v0 = vld [vmem:[#allocation7 + $0xa68] sm:$0xff]  ;;  %v2487_v2 = vpack.c.bf16 %v528_v59, %v527_v58  ;;  %v2499_v58 = vpack.c.bf16 %v1408_v56, %v1407_v32  ;;  %v1424_v59 = vld [vmem:[#allocation10 + $0x118] sm:$0xff] }
 0x110   :  { %2438 = vmatpush3.bf16.msra.mxu0 %v2437_v9  ;;  %v2457_v8 = vpack.c.bf16 %v480_v0, %v479_v63  ;;  %v2489_v9 = vpack.c.bf16 %v512_v3, %v511_v1  ;;  %v1389_v52 = vld [vmem:[#allocation10] sm:$0xff]  ;;  %v1410_v1 = vld [vmem:[#allocation10 + $0xa8] sm:$0xff] }
 0x111   :  { %2440 = vmatprep.subr.bf16.mxu0 %v2439_v13  ;;  %v481_v13 = vld [vmem:[#allocation7 + $0xa70] sm:$0xff]  ;;  %v1409_v0 = vld [vmem:[#allocation10 + $0xa0] sm:$0xff] }
 0x112   :  { %2470 = vmatpush3.bf16.msra.mxu1 %v2469_v11  ;;  %v2459_v11 = vpack.c.bf16 %v498_v5, %v497_v4  ;;  %v2461_v19 = vpack.c.bf16 %v482_v14, %v481_v13  ;;  %v2503_v3 = vpack.c.bf16 %v1410_v1, %v1409_v0  ;;  %v1426_v4 = vld [vmem:[#allocation10 + $0x128] sm:$0xff]  ;;  %v1393_v5 = vld [vmem:[#allocation10 + $0x20] sm:$0xff]  ;;  %v1427_v13 = vld [vmem:[#allocation10 + $0x130] sm:$0xff] }
 0x113   :  { %2472 = vmatprep.subr.bf16.mxu1 %v2471_v17  ;;  %v514_v17 = vld [vmem:[#allocation7 + $0xb78] sm:$0xff]  ;;  %v1402_v32 = vld [vmem:[#allocation10 + $0x68] sm:$0xff] }
 0x114   :  { %2442 = vmatpush3.bf16.msra.mxu0 %v2441_v38  ;;  %v2493_v20 = vpack.c.bf16 %v514_v17, %v513_v16  ;;  %v137_v38 = vmul.f32 %v2569_v24, %v2902_v12  ;;  %v1395_v16 = vld [vmem:[#allocation10 + $0x30] sm:$0xff]  ;;  %v1396_v17 = vld [vmem:[#allocation10 + $0x38] sm:$0xff]  ;;  %v1429_v24 = vld [vmem:[#allocation10 + $0x140] sm:$0xff] }
 0x115   :  { %2444 = vmatprep.subr.bf16.mxu0 %v2443_v26  ;;  %v140_v26 = vld [vmem:[#allocation9 + $0x1] sm:$0x1]  ;;  %v1403_v1 = vld [vmem:[#allocation10 + $0x70] sm:$0xff] }
 0x116   :  { %2474 = vmatpush3.bf16.msra.mxu1 %v2473_v25  ;;  %v139_v25 = vld [vmem:[#allocation9] sm:$0x1]  ;;  %v143_v28 = vmul.f32 %v140_v26, %v2881_v41  ;;  %v1397_v26 = vld [vmem:[#allocation10 + $0x40] sm:$0xff] }
 0x117   :  { %2476 = vmatprep.subr.bf16.mxu1 %v2475_v30  ;;  %v142_v27 = vmul.f32 %v139_v25, %v2846_v10  ;;  %v141_v30 = vld [vmem:[#allocation9 + $0x2] sm:$0x1]  ;;  %v1430_v25 = vld [vmem:[#allocation10 + $0x148] sm:$0xff] }
 0x118   :  { %2446 = vmatpush3.bf16.msra.mxu0 %v2445_v37  ;;  %v145_v33 = vmul.f32 %v141_v30, %v2902_v12  ;;  %v1415_v30 = vld [vmem:[#allocation10 + $0xd0] sm:$0xff]  ;;  %v1436_v0 = vld [vmem:[#allocation10 + $0x178] sm:$0xff] }
 0x119   :  { %2448 = vmatprep.subr.bf16.mxu0 %v2447_v18  ;;  %v144_v31 = vadd.f32 %v143_v28, %v142_v27  ;;  %v1398_v27 = vld [vmem:[#allocation10 + $0x48] sm:$0xff]  ;;  %v2540_v28 = vpack.c.bf16 %v1430_v25, %v1429_v24 }
 0x11a   :  { %2478 = vmatpush3.bf16.msra.mxu1 %v2477_v39  ;;  %v2513_v29 = vpack.c.bf16 %v1398_v27, %v1397_v26 }
 0x11b   :  { %2480 = vmatprep.subr.bf16.mxu1 %v2479_v23  ;;  %v146_v35 = vadd.f32 %v145_v33, %v144_v31  ;;  %v1416_v31 = vld [vmem:[#allocation10 + $0xd8] sm:$0xff]  ;;  %v1431_v33 = vld [vmem:[#allocation10 + $0x150] sm:$0xff] }
 0x11c   :  { %2450 = vmatpush3.bf16.msra.mxu0 %v2449_v49  ;;  %v2732_v49 = vmov 0.0|0.0  }
 0x11d   :  { %2452 = vmatprep.subr.bf16.mxu0 %v2451_v51  ;;  %v535_v39 = vrot.slane %v146_v35, %v534_v36  ;;  %v1422_v51 = vld [vmem:[#allocation10 + $0x108] sm:$0xff]  ;;  %v2515_v35 = vpack.c.bf16 %v1416_v31, %v1415_v30 }
 0x11e   :  { %2482 = vmatpush3.bf16.msra.mxu1 %v2481_v50  ;;  %v2495_v50 = vpack.c.bf16 %v1406_v45, %v1405_v47  ;;  %v2528_v54 = vpack.c.bf16 %v1422_v51, %v1421_v48  ;;  %v1417_v48 = vld [vmem:[#allocation10 + $0xe0] sm:$0xff] }
 0x11f   :  { %2484 = vmatprep.subr.bf16.mxu1 %v2483_v55  ;;  %v2497_v55 = vpack.c.bf16 %v1390_v53, %v1389_v52  ;;  %v1433_v51 = vld [vmem:[#allocation10 + $0x160] sm:$0xff] }
 0x120   :  { %2454 = vmatpush3.bf16.msra.mxu0 %v2453_v60  ;;  %v1391_v60 = vld [vmem:[#allocation10 + $0x10] sm:$0xff] }
 0x121   :  { %2456 = vmatprep.subr.bf16.mxu0 %v2455_v62  ;;  %v2531_v62 = vpack.c.bf16 %v1424_v59, %v1423_v57 }
 0x122   :  { %2486 = vmatpush3.bf16.msra.mxu1 %v2485_v61  ;;  %v1392_v61 = vld [vmem:[#allocation10 + $0x18] sm:$0xff] }
 0x123   :  { %2488 = vmatprep.subr.bf16.mxu1 %v2487_v2  ;;  %v2501_v63 = vpack.c.bf16 %v1392_v61, %v1391_v60  ;;  %v1425_v2 = vld [vmem:[#allocation10 + $0x120] sm:$0xff]  ;;  %v1419_v60 = vld [vmem:[#allocation10 + $0xf0] sm:$0xff]  ;;  %v1420_v61 = vld [vmem:[#allocation10 + $0xf8] sm:$0xff] }
 0x124   :  { %2458 = vmatpush3.bf16.msra.mxu0 %v2457_v8  ;;  %v1412_v8 = vld [vmem:[#allocation10 + $0xb8] sm:$0xff] }
 0x125   :  { %2460 = vmatprep.subr.bf16.mxu0 %v2459_v11  ;;  %v2505_v11 = vpack.c.bf16 %v1394_v6, %v1393_v5  ;;  %v2507_v14 = vpack.c.bf16 %v1412_v8, %v1411_v7 }
 0x126   :  { %2490 = vmatpush3.bf16.msra.mxu1 %v2489_v9  ;;  %v2534_v9 = vpack.c.bf16 %v1426_v4, %v1425_v2  ;;  %v1404_v2 = vld [vmem:[#allocation10 + $0x78] sm:$0xff] }
 0x127   :  { %2492 = vmatprep.subr.bf16.mxu1 %v2491_v15  ;;  %v1428_v15 = vld [vmem:[#allocation10 + $0x138] sm:$0xff]  ;;  %v2525_v4 = vpack.c.bf16 %v1404_v2, %v1403_v1 }
 0x128   :  { %2462 = vmatpush3.bf16.msra.mxu0 %v2461_v19  ;;  %v1413_v19 = vld [vmem:[#allocation10 + $0xc0] sm:$0xff]  ;;  %v2537_v21 = vpack.c.bf16 %v1428_v15, %v1427_v13 }
 0x129   :  { %2496 = vmatprep.subr.bf16.mxu0 %v2495_v50  ;;  %v1418_v50 = vld [vmem:[#allocation10 + $0xe8] sm:$0xff] }
 0x12a   :  { %2494 = vmatpush3.bf16.msra.mxu1 %v2493_v20  ;;  %v1414_v20 = vld [vmem:[#allocation10 + $0xc8] sm:$0xff]  ;;  %v2519_v53 = vpack.c.bf16 %v1418_v50, %v1417_v48  ;;  %v1382_v48 = vld [vmem:[#allocation12 + $0x1] sm:$0x1] }
 0x12b   :  { %1302 = vmatmul.mubr.f32.vlgmr.msra.gmra.mrb[10].mxu0 %v135_v22  ;;  %2527 = vmatprep.subr.bf16.mxu1 %v2732_v49  ;;  %v2509_v22 = vpack.c.bf16 %v1396_v17, %v1395_v16 }
 0x12c   :  { %2498 = vmatpush3.bf16.msra.mxu0 %v2497_v55  ;;  %v1401_v55 = vld [vmem:[#allocation10 + $0x60] sm:$0xff] }
 0x12d   :  { %1372 = vmatmul.mubr.f32.vlgmr.msra.gmra.mrb[10].mxu1 %v137_v38  ;;  %2500 = vmatprep.subr.bf16.mxu0 %v2499_v58  ;;  %v2511_v38 = vpack.c.bf16 %v1414_v20, %v1413_v19  ;;  %v2521_v58 = vpack.c.bf16 %v1402_v32, %v1401_v55 }
 0x12e   :  { %2529 = vmatpush3.bf16.msra.mxu1 %v2528_v54  ;;  %v1434_v54 = vld [vmem:[#allocation10 + $0x168] sm:$0xff] }
 0x12f   :  { %2530 = vmatprep.subr.bf16.mxu1 %v2732_v49  ;;  %v2546_v57 = vpack.c.bf16 %v1434_v54, %v1433_v51  ;;  %v1385_v51 = vmul.f32 %v1382_v48, %v2881_v41 }
 0x130   :  { %2502 = vmatpush3.bf16.msra.mxu0 %v2501_v63  ;;  %v2523_v63 = vpack.c.bf16 %v1420_v61, %v1419_v60 }
 0x131   :  { %2504 = vmatprep.subr.bf16.mxu0 %v2503_v3 }
 0x132   :  { %2532 = vmatpush3.bf16.msra.mxu1 %v2531_v62  ;;  %v1435_v62 = vld [vmem:[#allocation10 + $0x170] sm:$0xff] }
 0x133   :  { %2533 = vmatprep.subr.bf16.mxu1 %v2732_v49  ;;  %v2549_v3 = vpack.c.bf16 %v1436_v0, %v1435_v62 }
 0x134   :  { %2506 = vmatpush3.bf16.msra.mxu0 %v2505_v11 }
 0x135   :  { %2508 = vmatprep.subr.bf16.mxu0 %v2507_v14 }
 0x136   :  { %2535 = vmatpush3.bf16.msra.mxu1 %v2534_v9 }
 0x137   :  { %2536 = vmatprep.subr.bf16.mxu1 %v2732_v49 }
 0x138   :  { %2510 = vmatpush3.bf16.msra.mxu0 %v2509_v22 }
 0x139   :  { %2512 = vmatprep.subr.bf16.mxu0 %v2511_v38 }
 0x13a   :  { %2538 = vmatpush3.bf16.msra.mxu1 %v2537_v21 }
 0x13b   :  { %2539 = vmatprep.subr.bf16.mxu1 %v2732_v49 }
 0x13c   :  { %2514 = vmatpush3.bf16.msra.mxu0 %v2513_v29 }
 0x13d   :  { %2516 = vmatprep.subr.bf16.mxu0 %v2515_v35 }
 0x13e   :  { %2541 = vmatpush3.bf16.msra.mxu1 %v2540_v28 }
 0x13f   :  { %2542 = vmatprep.subr.bf16.mxu1 %v2732_v49 }
 0x15e   :  { %v1636_v37 = vpop.f32.mrb[0].mxu0 }
 0x15f   :  { %v1637_v18 = vpop.f32.mrb[1].mxu0 }
 0x160   :  { %v1671_v42 = vpop.f32.mrb[0].mxu1  ;;  %v1638_v43 = vadd.f32 %v1637_v18, %v1636_v37  ;;  %v1432_v37 = vld [vmem:[#allocation10 + $0x158] sm:$0xff] }
 0x161   :  { %v1672_v44 = vpop.f32.mrb[1].mxu1  ;;  %v1400_v18 = vld [vmem:[#allocation10 + $0x58] sm:$0xff] }
 0x162   :  { %v1673_v23 = vadd.f32 %v1672_v44, %v1671_v42  ;;  %v604_v40 = vadd.f32 %v1638_v43, %v535_v39  ;;  %v1399_v39 = vld [vmem:[#allocation10 + $0x50] sm:$0xff]  ;;  %v2543_v43 = vpack.c.bf16 %v1432_v37, %v1431_v33 }
 0x163   :  { %v2517_v44 = vpack.c.bf16 %v1400_v18, %v1399_v39 }
 0x164   :  { %v2925_v46 = vadd.f32 %v1673_v23, %v604_v40  ;;  %2544 = vmatpush3.bf16.msra.mxu1 %v2543_v43 }
 0x165   :  { %2518 = vmatpush3.bf16.msra.mxu0 %v2517_v44  ;;  %2545 = vmatprep.subr.bf16.mxu1 %v2732_v49 }
 0x166   :  { %2520 = vmatprep.subr.bf16.mxu0 %v2519_v53 }
 0x168   :  { %2547 = vmatpush3.bf16.msra.mxu1 %v2546_v57 }
 0x169   :  { %2522 = vmatpush3.bf16.msra.mxu0 %v2521_v58  ;;  %2548 = vmatprep.subr.bf16.mxu1 %v2732_v49 }
 0x16a   :  { %2524 = vmatprep.subr.bf16.mxu0 %v2523_v63 }
 0x16c   :  { %2550 = vmatpush3.bf16.msra.mxu1 %v2549_v3 }
 0x16d   :  { %2526 = vmatpush3.bf16.msra.mxu0 %v2525_v4 }
 0x17e   :  { %v1706_v42 = vpop.f32.mrb[2].mxu0 }
 0x17f   :  { %v1707_v23 = vpop.f32.mrb[3].mxu0 }
 0x180   :  { %v1741_v40 = vpop.f32.mrb[2].mxu1  ;;  %v1708_v47 = vadd.f32 %v1707_v23, %v1706_v42 }
 0x181   :  { %v1742_v45 = vpop.f32.mrb[3].mxu1 }
 0x182   :  { %v1743_v52 = vadd.f32 %v1742_v45, %v1741_v40  ;;  %v744_v56 = vadd.f32 %v1708_v47, %v2925_v46  ;;  %v2734_v46 = vmov 0.0   ;;  %v1381_v45 = vld [vmem:[#allocation12] sm:$0x1] }
 0x183   :  { %2108 = vmatprep.mubr.msk.f32.mxu1 %vm2733_vm0, %v2734_v46  ;;  %v1384_v50 = vmul.f32 %v1381_v45, %v2846_v10 }
 0x184   :  { %v814_v59 = vadd.f32 %v1743_v52, %v744_v56  ;;  %v1383_v52 = vld [vmem:[#allocation12 + $0x2] sm:$0x1] }
 0x185   :  { %v1386_v53 = vadd.f32 %v1385_v51, %v1384_v50  ;;  %v1387_v54 = vmul.f32 %v1383_v52, %v2902_v12 }
 0x187   :  { %v1388_v55 = vadd.f32 %v1387_v54, %v1386_v53 }
 0x189   :  { %v1441_v58 = vrot.slane %v1388_v55, %v534_v36 }
 0x19e   :  { %v1776_v5 = vpop.f32.mrb[4].mxu0 }
 0x19f   :  { %v1777_v6 = vpop.f32.mrb[5].mxu0 }
 0x1a0   :  { %v1811_v7 = vpop.f32.mrb[4].mxu1  ;;  %v1778_v8 = vadd.f32 %v1777_v6, %v1776_v5 }
 0x1a1   :  { %v1812_v9 = vpop.f32.mrb[5].mxu1 }
 0x1a2   :  { %v1813_v11 = vadd.f32 %v1812_v9, %v1811_v7  ;;  %v884_v13 = vadd.f32 %v1778_v8, %v814_v59 }
 0x1a4   :  { %v954_v49 = vadd.f32 %v1813_v11, %v884_v13 }
 0x1be   :  { %v1846_v14 = vpop.f32.mrb[6].mxu0 }
 0x1bf   :  { %v1847_v15 = vpop.f32.mrb[7].mxu0 }
 0x1c0   :  { %v1881_v16 = vpop.f32.mrb[6].mxu1  ;;  %v1848_v17 = vadd.f32 %v1847_v15, %v1846_v14 }
 0x1c1   :  { %v1882_v19 = vpop.f32.mrb[7].mxu1 }
 0x1c2   :  { %v1883_v20 = vadd.f32 %v1882_v19, %v1881_v16  ;;  %v1024_v21 = vadd.f32 %v1848_v17, %v954_v49 }
 0x1c4   :  { %v1094_v22 = vadd.f32 %v1883_v20, %v1024_v21 }
 0x1de   :  { %v1916_v24 = vpop.f32.mrb[8].mxu0 }
 0x1df   :  { %v1917_v38 = vpop.f32.mrb[9].mxu0 }
 0x1e0   :  { %v1951_v25 = vpop.f32.mrb[8].mxu1  ;;  %v1918_v26 = vadd.f32 %v1917_v38, %v1916_v24 }
 0x1e1   :  { %v1952_v27 = vpop.f32.mrb[9].mxu1 }
 0x1e2   :  { %v1953_v28 = vadd.f32 %v1952_v27, %v1951_v25  ;;  %v1164_v29 = vadd.f32 %v1918_v26, %v1094_v22 }
 0x1e4   :  { %v1234_v30 = vadd.f32 %v1953_v28, %v1164_v29 }
 0x1fe   :  { %v1986_v31 = vpop.f32.mrb[10].mxu0 }
 0x1ff   :  { %v1987_v33 = vpop.f32.mrb[11].mxu0 }
 0x200   :  { %v2021_v35 = vpop.f32.mrb[10].mxu1  ;;  %v1988_v37 = vadd.f32 %v1987_v33, %v1986_v31 }
 0x201   :  { %v2022_v39 = vpop.f32.mrb[11].mxu1 }
 0x202   :  { %v2023_v18 = vadd.f32 %v2022_v39, %v2021_v35  ;;  %v1304_v42 = vadd.f32 %v1988_v37, %v1234_v30 }
 0x204   :  { %v1374_v43 = vadd.f32 %v2023_v18, %v1304_v42 }
 0x206   :  { %v1377_v44 = vmax.f32 %v1374_v43, 0.0 }
 0x208   :  { %v1379_v23 = vmul.f32 %v1377_v44, %v2881_v41  ;;  %v1380_v40 = vmul.f32 %v1377_v44, %v2902_v12  ;;  %v1378_v47 = vmul.f32 %v1377_v44, %v2846_v10 }
 0x20a   :  { %1507 = vmatprep.mubr.f32.mxu0 %v1379_v23  ;;  %2109 = vmatmul.mubr.f32.vlgmr.msra.gmra.mrb[12].mxu1 %v1380_v40 }
 0x20b   :  { %1508 = vmatmul.mubr.f32.vlgmr.msra.gmra.mrb[12].mxu0 %v1378_v47 }
 0x2dd   :  { %v1579_v32 = vpop.f32.mrb[12].mxu1 }
 0x2de   :  { %v2056_v56 = vpop.f32.mrb[12].mxu0  ;;  %v2110_v57 = vpop.f32.mrb[13].mxu1 }
 0x2df   :  { %v2057_v59 = vpop.f32.mrb[13].mxu0 }
 0x2e0   :  { %v2058_v60 = vadd.f32 %v2057_v59, %v2056_v56 }
 0x2e2   :  { %v1510_v61 = vadd.f32 %v2058_v60, %v1441_v58 }
 0x2e4   :  { %v1580_v62 = vadd.f32 %v1579_v32, %v1510_v61 }
 0x2e6   :  { %1583 = vst [vmem:[#allocation13] sm:$0xff] %v1580_v62 }
 0x2e7   :  { %2701 = shalt.err (!%p2698_p5)
}
 0x2e8   :  { %s2702_s23 = scalar_lea.hbm %s2962_s6, 128 }
 0x2e9   :  { %p2703_p6 = scmp.ne.s32.totalorder %s2962_s6, %s2702_s23  ;;  %p2706_p7 = scmp.lt.u32.totalorder %s2702_s23, %s2962_s6 }
 0x2eb   :  { %p2708_p8 = pnand %p2706_p7, %p2703_p6 }
 0x2ed   :  { %2711 = shalt.err (!%p2708_p8)
}
 0x2ee   :  { %1593 = dma.vmem_to_hbm [thread:$0]  %s1591_s20, 128, %s2962_s6, [#allocation4]  }
 0x2ef   :  { %2720 = dma.done.wait [#allocation4], 128  }
 0x2f0   :  { %2721 = vsyncadd [#allocation4], 4294967168 }
 0x2f1   :  { %1597 = vsyncpa [#allocation3], 1 }
 0x2f2   :  { %1598 = vsyncpa [#allocation8], 1 }
 0x2f3   :  { %1599 = vsyncpa [#allocation11], 1 }
 0x2f4   :  { %1600 = vsyncpa [#allocation4], 1 }
 0x2f5   :  { %1601 = vsyncpa [#allocation5], 1 }

</bundles_post_ra>
